<compile_context>
chip_gen: v7x
topology: tpu7x:2x2x1
jax: 0.10.0
libtpu: 0.0.40
codegen_flags: <defaults>
</compile_context>

<pallas_src>
import functools

import jax
import jax.numpy as jnp
from jax.experimental import pallas as pl
from jax.experimental.pallas import tpu as pltpu


_VALID_SETTINGS = ("exact_one", "close_to_one", "free")

# Below this many feature bytes, a fused XLA row-reduce beats pallas_call
# dispatch + pipeline warm-up (microseconds vs ~50-100 ns of HBM reads).
_KERNEL_MIN_BYTES = 2 * 1024 * 1024

# Per-buffer budget for the streamed features tile (Pallas double-buffers it).
# 8 MiB/buffer amortizes the ~0.35 us/step fixed cost to a few % of the tile
# DMA on every generation, while 2 x 8 MiB + weight/output + slack stays well
# inside v7x's 64 MiB physical VMEM (v5e/v6e have 128 MiB).
_TILE_BYTES_CAP = 8 * 1024 * 1024

# Cap on rows per tile: bounds the per-tile (block_n, 1) -> (1, block_n)
# lane-dense relayout of the matvec result and the resident output block.
_MAX_TILE_ROWS = 16 * 1024

# Minimum number of grid steps along N (when N is big enough to shard): keeps
# both v7x TensorCores busy under "parallel" semantics and lets the software
# pipeline ramp.
_MIN_GRID_STEPS = 4


def _vmem_capacity_bytes():
    try:
        return int(pltpu.get_tpu_info().vmem_capacity_bytes)
    except Exception:                      # conservative fallback: smallest gen
        return 64 * 1024 * 1024            # (v7x: 64 MiB per TensorCore)


def _weighting_kernel(x_ref, w_ref, b_ref, o_ref, *, setting, tanh_scalar,
                      num_features, mask_ragged_f):
    """Processes one (block_n, block_f) feature tile.

    Grid = (N tiles, F tiles).  The output block index depends only on the N
    axis, so o_ref stays resident across the innermost "arbitrary" F axis and
    doubles as the f32 accumulator (init at f==0, finalize at f==last).
    """
    f_idx = pl.program_id(1)

    @pl.when(f_idx == 0)
    def _init():
        o_ref[...] = jnp.zeros_like(o_ref)

    x = x_ref[...]                                    # (block_n, block_f) native
    w = w_ref[...]                                    # (block_f, 1)
    if x.dtype == jnp.bfloat16:
        # Native bf16 MXU pass (f32 accumulate); weight was pre-cast to bf16,
        # so no eager widen of the whole tile (v6e/v7x have bf16 datapaths).
        precision = None
    else:
        x = x.astype(jnp.float32)
        precision = jax.lax.Precision.HIGHEST         # keep f32 Linear numerics

    if mask_ragged_f:
        # The last F tile reads past column num_features; zero the tails of
        # both operands so out-of-bounds garbage never reaches the accumulator.
        base = f_idx * x.shape[1]
        col = jax.lax.broadcasted_iota(jnp.int32, (1, x.shape[1]), 1) + base
        x = jnp.where(col < num_features, x, jnp.zeros((), x.dtype))
        row = jax.lax.broadcasted_iota(jnp.int32, (x.shape[1], 1), 0) + base
        w = jnp.where(row < num_features, w, jnp.zeros((), w.dtype))

    # MXU matvec (the MXU is otherwise idle in this memory-bound kernel);
    # the (block_n, 1) partial is relaid out once per tile into the
    # lane-dense (1, block_n) accumulator/output row.
    partial = jnp.dot(x, w, preferred_element_type=jnp.float32,
                      precision=precision)
    o_ref[...] += partial.reshape(1, -1)

    @pl.when(f_idx == pl.num_programs(1) - 1)
    def _finalize():
        y = o_ref[...] + b_ref[0, 0]                  # bias scalar from SMEM
        if setting == "close_to_one":
            y = 1.0 + jnp.tanh(y) / tanh_scalar       # tanh runs on the EUP
        o_ref[...] = y


def _choose_blocks(n, f, itemsize, tile_rows, tile_cols, tile_budget):
    # --- F (contraction) tile: only tiled when even a minimal 128-row slab of
    #     the full feature width would blow the per-buffer budget.
    if tile_cols is not None:
        block_f = min(int(tile_cols), f)
        if block_f < f:
            assert block_f % 128 == 0, "tile_cols must be a multiple of 128"
    elif 128 * f * itemsize <= tile_budget:
        block_f = f
    else:
        block_f = max(128, ((tile_budget // (128 * itemsize)) // 128) * 128)

    # --- N (node/batch) tile: as big as the budget allows, but force several
    #     grid steps when there is enough work (v7x dual-TC sharding).
    if tile_rows is not None:
        block_n = int(tile_rows)
    else:
        rows = tile_budget // max(1, block_f * itemsize)
        rows = max(128, (rows // 128) * 128)
        rows = min(rows, _MAX_TILE_ROWS)
        if n >= _MIN_GRID_STEPS * 128:
            rows = min(rows, max(128, ((n // _MIN_GRID_STEPS) // 128) * 128))
        block_n = rows

    if block_n >= n:
        grid_n, block_n = 1, n             # full-extent N block: any n is legal
    else:
        assert block_n % 128 == 0, "tile_rows must be a multiple of 128"
        grid_n = pl.cdiv(n, block_n)
    grid_f = pl.cdiv(f, block_f)
    return grid_n, block_n, grid_f, block_f


def weighting_model_forward(features, weight, bias, *, setting, tanh_scalar=10,
                            tile_rows=None, tile_cols=None, force_kernel=False):
    """Pallas port of WeightingModel.forward.

    features: [N, F] (float32 or bfloat16); weight: torch-style [1, F]; bias: [1].
    Returns a scalar (exact_one) or an [N] float32 vector.
    """
    assert setting in _VALID_SETTINGS, f"invalid setting {setting}."
    if setting == "exact_one":
        # The reference returns a fresh scalar tensor; no tensor compute.
        return jnp.asarray(1.0, dtype=jnp.float32)

    n, f = features.shape
    # bf16 features -> keep the MXU pass in bf16 (f32 accumulate); else f32.
    w_dtype = jnp.bfloat16 if features.dtype == jnp.bfloat16 else jnp.float32
    w_col = jnp.asarray(weight, jnp.float32).astype(w_dtype).reshape(f, 1)
    b = jnp.asarray(bias, jnp.float32).reshape(1, 1)

    itemsize = jnp.dtype(features.dtype).itemsize
    if not force_kernel and n * f * itemsize < _KERNEL_MIN_BYTES:
        # Small problem: a fused XLA row-reduce beats kernel dispatch overhead.
        w_row = w_col.astype(jnp.float32).reshape(1, f)
        y = jnp.sum(features.astype(jnp.float32) * w_row, axis=-1) + b[0, 0]
        if setting == "close_to_one":
            y = 1.0 + jnp.tanh(y) / tanh_scalar
        return y

    vmem_cap = _vmem_capacity_bytes()
    tile_budget = min(_TILE_BYTES_CAP, vmem_cap // 4)
    grid_n, block_n, grid_f, block_f = _choose_blocks(
        n, f, itemsize, tile_rows, tile_cols, tile_budget)
    out_cols = grid_n * block_n

    # Scoped VMEM: double-buffered features tile + small weight/output blocks
    # + slack, capped at 3/4 of this generation's physical VMEM.
    vmem_limit = 2 * block_n * block_f * itemsize + (8 << 20)
    vmem_limit = max(24 << 20, min(vmem_limit, (vmem_cap * 3) // 4))

    kernel = functools.partial(
        _weighting_kernel,
        setting=setting,
        tanh_scalar=float(tanh_scalar),
        num_features=f,
        mask_ragged_f=(block_f < f and f % block_f != 0),
    )

    out = pl.pallas_call(
        kernel,
        out_shape=jax.ShapeDtypeStruct((1, out_cols), jnp.float32),
        grid_spec=pltpu.PrefetchScalarGridSpec(
            num_scalar_prefetch=0,
            grid=(grid_n, grid_f),
            in_specs=[
                # features streamed tile-by-tile in their native dtype.
                pl.BlockSpec((block_n, block_f), lambda i, j: (i, j)),
                # weight column: same block revisited along N -> stays resident.
                pl.BlockSpec((block_f, 1), lambda i, j: (j, 0)),
                # bias scalar lives in SMEM (no VMEM block / DMA bookkeeping).
                pl.BlockSpec(memory_space=pltpu.SMEM),
            ],
            # Lane-dense (1, block_n) output row; same block across the F axis
            # -> resident, doubles as the f32 accumulator.
            out_specs=pl.BlockSpec((1, block_n), lambda i, j: (0, i)),
        ),
        compiler_params=pltpu.CompilerParams(
            dimension_semantics=("parallel", "arbitrary"),
            vmem_limit_bytes=int(vmem_limit),
        ),
    )(features, w_col, b)

    # Columns >= n of a ragged last N tile hold values computed from
    # out-of-bounds feature rows; they are dropped here.  Keep this slice if
    # the output handling ever changes.  (torch .squeeze() of (N,1) -> (N,).)
    return out[0, :n]


if __name__ == "__main__":
    key = jax.random.PRNGKey(0)
    k_w, k_b, k1, k2, k3, k4, k_w2 = jax.random.split(key, 7)

    F = 128
    tanh_scalar = 10
    bound = 1.0 / (F ** 0.5)
    weight = jax.random.uniform(k_w, (1, F), minval=-bound, maxval=bound,
                                dtype=jnp.float32)
    bias = jax.random.uniform(k_b, (1,), minval=-bound, maxval=bound,
                              dtype=jnp.float32)

    # (a) exact_one: constant scalar, no kernel.
    out_exact = weighting_model_forward(jnp.zeros((4, F), jnp.float32),
                                        weight, bias, setting="exact_one")

    # (b) close_to_one, f32, multi-step parallel grid with a ragged last N tile.
    N1 = 1200
    x1 = jax.random.normal(k1, (N1, F), dtype=jnp.float32)
    out_close = weighting_model_forward(x1, weight, bias, setting="close_to_one",
                                        tanh_scalar=tanh_scalar, force_kernel=True)

    # (c) free, f32, single full-extent block (N not 8-aligned).
    N2 = 300
    x2 = jax.random.normal(k2, (N2, F), dtype=jnp.float32)
    out_free = weighting_model_forward(x2, weight, bias, setting="free",
                                       force_kernel=True)

    # (d) free, native bf16 streaming (bf16 MXU pass), 4 grid steps.
    N3 = 2048
    x3 = jax.random.normal(k3, (N3, F), dtype=jnp.float32)
    x3_bf16 = x3.astype(jnp.bfloat16)
    out_bf16 = weighting_model_forward(x3_bf16, weight, bias, setting="free",
                                       force_kernel=True)

    # (e) F-tiled path with ragged-F masking: F=320 forced into 128x128 blocks.
    F2, N4 = 320, 384
    bound2 = 1.0 / (F2 ** 0.5)
    weight2 = jax.random.uniform(k_w2, (1, F2), minval=-bound2, maxval=bound2,
                                 dtype=jnp.float32)
    x4 = jax.random.normal(k4, (N4, F2), dtype=jnp.float32)
    out_ftile = weighting_model_forward(x4, weight2, bias, setting="free",
                                        force_kernel=True,
                                        tile_rows=128, tile_cols=128)

    # (f) tiny input -> fused XLA fallback path (below _KERNEL_MIN_BYTES).
    xs = x2[:8, :96]
    ws = weight[:, :96]
    out_small = weighting_model_forward(xs, ws, bias, setting="close_to_one",
                                        tanh_scalar=tanh_scalar)

    jax.block_until_ready(
        (out_exact, out_close, out_free, out_bf16, out_ftile, out_small))

    # Pure-JAX references (exact f32 VPU math, no MXU precision ambiguity).
    def ref_fwd(x, w, setting_):
        y = jnp.sum(x.astype(jnp.float32) * jnp.asarray(w, jnp.float32),
                    axis=-1) + bias[0]
        if setting_ == "close_to_one":
            y = 1.0 + jnp.tanh(y) / tanh_scalar
        return y

    ref_close = ref_fwd(x1, weight, "close_to_one")
    ref_free = ref_fwd(x2, weight, "free")
    w_bf16 = weight.astype(jnp.bfloat16)              # kernel uses bf16 weights
    ref_bf16 = ref_fwd(x3_bf16, w_bf16, "free")
    ref_ftile = ref_fwd(x4, weight2, "free")
    ref_small = ref_fwd(xs, ws, "close_to_one")

    assert out_exact.shape == () and float(out_exact) == 1.0
    assert out_close.shape == (N1,) and out_free.shape == (N2,)
    assert out_bf16.shape == (N3,) and out_ftile.shape == (N4,)
    assert out_small.shape == (8,)
    assert jnp.allclose(out_close, ref_close, atol=1e-5, rtol=1e-5)
    assert jnp.allclose(out_free, ref_free, atol=1e-5, rtol=1e-5)
    assert jnp.allclose(out_bf16, ref_bf16, atol=1e-4, rtol=1e-4)
    assert jnp.allclose(out_ftile, ref_ftile, atol=1e-5, rtol=1e-5)
    assert jnp.allclose(out_small, ref_small, atol=1e-5, rtol=1e-5)

    print("KERNEL_OK")
</pallas_src>

<mosaic_0001>
module attributes {stable_mosaic.version = 11 : i64} {
  func.func @_weighting_kernel(%arg0: i32, %arg1: i32, %arg2: memref<256x128xf32, #tpu.memory_space<vmem>>, %arg3: memref<128x1xf32, #tpu.memory_space<vmem>>, %arg4: memref<1x1xf32, #tpu.memory_space<smem>>, %arg5: memref<1x256xf32, #tpu.memory_space<vmem>>) attributes {dimension_semantics = [#tpu.dimension_semantics<parallel>, #tpu.dimension_semantics<arbitrary>], iteration_bounds = array<i64: 5, 1>, scalar_prefetch = 0 : i64, scratch_operands = 0 : i64, tpu.core_type = #tpu.core_type<tc>, window_params = [{transform_indices = @transform_0, window_bounds = array<i64: 256, 128>}, {transform_indices = @transform_1, window_bounds = array<i64: 128, 1>}, {transform_indices = @transform_2, window_bounds = array<i64: 1, 1>}, {transform_indices = @transform_3, window_bounds = array<i64: 1, 256>}]} {
    %c0_i32 = arith.constant 0 : i32
    %0 = arith.cmpi eq, %arg1, %c0_i32 : i32
    %1 = arith.extui %0 : i1 to i32
    %c0_i32_0 = arith.constant 0 : i32
    %2 = arith.cmpi ne, %1, %c0_i32_0 : i32
    scf.if %2 {
      %cst_10 = arith.constant 0.000000e+00 : f32
      %13 = vector.broadcast %cst_10 : f32 to vector<1x256xf32>
      %c0_11 = arith.constant 0 : index
      %c0_12 = arith.constant 0 : index
      %14 = vector.load %arg5[%c0_11, %c0_12] : memref<1x256xf32, #tpu.memory_space<vmem>>, vector<1x256xf32>
      tpu.vector_store %arg5[%c0_11, %c0_12], %13 {strides = array<i32>} : memref<1x256xf32, #tpu.memory_space<vmem>>, vector<1x256xf32>,
    } else {
    }
    %c0 = arith.constant 0 : index
    %c0_1 = arith.constant 0 : index
    %3 = vector.load %arg2[%c0, %c0_1] : memref<256x128xf32, #tpu.memory_space<vmem>>, vector<256x128xf32>
    %c0_2 = arith.constant 0 : index
    %c0_3 = arith.constant 0 : index
    %4 = vector.load %arg3[%c0_2, %c0_3] : memref<128x1xf32, #tpu.memory_space<vmem>>, vector<128x1xf32>
    %cst = arith.constant dense<0.000000e+00> : vector<256x1xf32>
    %5 = tpu.matmul %3, %4, %cst {dimension_numbers = #tpu.dot_dimension_numbers<[1], [0], [0], [1], [0, 0, 1, 1], [], []>, precision = #tpu.contract_precision<fp32>} : vector<256x128xf32>, vector<128x1xf32>, vector<256x1xf32> -> vector<256x1xf32>
    %c0_4 = arith.constant 0 : index
    %c0_5 = arith.constant 0 : index
    %6 = vector.load %arg5[%c0_4, %c0_5] : memref<1x256xf32, #tpu.memory_space<vmem>>, vector<1x256xf32>
    %7 = vector.shape_cast %5 : vector<256x1xf32> to vector<1x256xf32>
    %8 = arith.addf %6, %7 : vector<1x256xf32>
    %c0_6 = arith.constant 0 : index
    %c0_7 = arith.constant 0 : index
    %9 = vector.load %arg5[%c0_6, %c0_7] : memref<1x256xf32, #tpu.memory_space<vmem>>, vector<1x256xf32>
    tpu.vector_store %arg5[%c0_6, %c0_7], %8 {strides = array<i32>} : memref<1x256xf32, #tpu.memory_space<vmem>>, vector<1x256xf32>,
    %c0_i32_8 = arith.constant 0 : i32
    %10 = arith.cmpi eq, %arg1, %c0_i32_8 : i32
    %11 = arith.extui %10 : i1 to i32
    %c0_i32_9 = arith.constant 0 : i32
    %12 = arith.cmpi ne, %11, %c0_i32_9 : i32
    scf.if %12 {
      %c0_10 = arith.constant 0 : index
      %c0_11 = arith.constant 0 : index
      %13 = vector.load %arg5[%c0_10, %c0_11] : memref<1x256xf32, #tpu.memory_space<vmem>>, vector<1x256xf32>
      %c0_12 = arith.constant 0 : index
      %c0_13 = arith.constant 0 : index
      %14 = memref.load %arg4[%c0_12, %c0_13] : memref<1x1xf32, #tpu.memory_space<smem>>
      %15 = vector.broadcast %14 : f32 to vector<1x256xf32>
      %16 = arith.addf %13, %15 : vector<1x256xf32>
      %17 = math.tanh %16 : vector<1x256xf32>
      %cst_14 = arith.constant 1.000000e+01 : f32
      %18 = vector.broadcast %cst_14 : f32 to vector<1x256xf32>
      %19 = arith.divf %17, %18 : vector<1x256xf32>
      %cst_15 = arith.constant 1.000000e+00 : f32
      %20 = vector.broadcast %cst_15 : f32 to vector<1x256xf32>
      %21 = arith.addf %20, %19 : vector<1x256xf32>
      %c0_16 = arith.constant 0 : index
      %c0_17 = arith.constant 0 : index
      %22 = vector.load %arg5[%c0_16, %c0_17] : memref<1x256xf32, #tpu.memory_space<vmem>>, vector<1x256xf32>
      tpu.vector_store %arg5[%c0_16, %c0_17], %21 {strides = array<i32>} : memref<1x256xf32, #tpu.memory_space<vmem>>, vector<1x256xf32>,
    } else {
    }
    return
  }
  func.func @transform_0(%arg0: i32, %arg1: i32) -> (i32, i32) {
    %c0_i32 = arith.constant 0 : i32
    return %arg0, %arg1 : i32, i32
  }
  func.func @transform_1(%arg0: i32, %arg1: i32) -> (i32, i32) {
    %c0_i32 = arith.constant 0 : i32
    %c0_i32_0 = arith.constant 0 : i32
    return %arg1, %c0_i32 : i32, i32
  }
  func.func @transform_2(%arg0: i32, %arg1: i32) -> (i32, i32) {
    %c0_i32 = arith.constant 0 : i32
    %c0_i32_0 = arith.constant 0 : i32
    %c0_i32_1 = arith.constant 0 : i32
    return %c0_i32, %c0_i32_0 : i32, i32
  }
  func.func @transform_3(%arg0: i32, %arg1: i32) -> (i32, i32) {
    %c0_i32 = arith.constant 0 : i32
    %c0_i32_0 = arith.constant 0 : i32
    return %c0_i32, %arg0 : i32, i32
  }
}

</mosaic_0001>

<bundles_post_ra>
// kernel: tpu_custom_call.1
= control target key start
LH: loop header
LB: loop body
LE: loop exit
PB: predicated region body
PF: predicated region fallthrough
CT: control target
= control target key end

     0   :  { %s9649_s0 = inlined_call_operand.hbm [shape: f32[1200,128], index: 0, kind: input, shape index: {}]   ;;  %s9650_s1 = inlined_call_operand.vmem [shape: f32[128,1], index: 1, kind: input, shape index: {}]   ;;  %s9651_s2 = inlined_call_operand.<no memory space> [shape: f32[1,1], index: 2, kind: input, shape index: {}]   ;;  %s9652_s3 = inlined_call_operand.hbm [shape: f32[1,1280], index: 3, kind: output, shape index: {}]  }
   0x1   :  { %8 = sst [smem:[#allocation2]] %s9651_s2 }
   0x2   :  { %9 = vsyncpa [#allocation4], 0 }
   0x3   :  { %11 = vsyncpa [#allocation4 + $0x1], 0 }
   0x4   :  { %12 = vsyncpa [#allocation5], 0 }
   0x5   :  { %14 = vsyncpa [#allocation5 + $0x1], 0  ;;  %s7282_s14 = smov 0   ;;  %s7284_s15 = smov 0  }
   0x6   :  { %s7286_s16 = smov 0   ;;  %s7288_s17 = smov 0  }
   0x7   :  { %s7290_s18 = smov 0   ;;  %s7292_s19 = smov 0  }
   0x8 LB: > { %s5869_s2 = sadd.s32 4294967295, %s7250_s19   ;;  %s5870_s20 = sadd.s32 4294967294, %s7250_s19   ;;  %s7250_s19 = sphi %s7292_s19, %s20_s19   ;;  %s7246_s18 = sphi %s7290_s18, %s10001_s18   ;;  %s7242_s17 = sphi %s7288_s17, %s10000_s17   ;;  %s7238_s16 = sphi %s7286_s16, %s9999_s16   ;;  %s7234_s15 = sphi %s7284_s15, %s9998_s15   ;;  %s7230_s14 = sphi %s7282_s14, %s9997_s14  }
   0x9   : > { %s32_s21 = sadd.s32 1, %s7246_s18  ;;  %s41_s22 = sadd.s32 1, %s7238_s16 }
   0xa   : > { %p34_p0 = scmp.ge.s32.totalorder %s32_s21, 5  ;;  %p48_p1 = scmp.ne.s32.totalorder %s7238_s16, %s7234_s15 }
   0xb   : > { %p49_p2 = scmp.eq.s32.totalorder %s7250_s19, 0  ;;  %p54_p3 = scmp.ne.s32.totalorder %s7234_s15, %s7230_s14 }
   0xc   : > { %s10003_s21 = smov (%p34_p0, %s32_s21), 0  ;;  %p55_p5 = scmp.eq.s32.totalorder %s5869_s2, 0 }
   0xd   : > { %p50_p4 = por %p49_p2, %p48_p1  ;;  %s36_s23 = ssub.s32 %s7246_s18, %s10003_s21 }
   0xe   : > { %p125_p6 = scmp.eq.s32.totalorder %s5869_s2, 4  ;;  %p39_p7 = scmp.eq.s32.totalorder %s36_s23, 0 }
   0xf   : > { %p7325_p8 = por %p55_p5, %p54_p3  ;;  %p131_p10 = scmp.eq.s32.totalorder %s5870_s20, 4 }
  0x10   : > { %p7329_p9 = por %p125_p6, %p48_p1  ;;  %p5873_p12 = scmp.ge.s32.totalorder %s7250_s19, 5 }
  0x11   : > { %s7334_s26 = scalar_select %p39_p7, %s7238_s16, %s41_s22  }
  0x12   : > { %p7336_p11 = por %p131_p10, %p54_p3  ;;  %159 = sbr.rel (%p5873_p12) target bundleno = 60 (0x3c), region = 24 }
  0x14   : > { %s9738_s27 = scalar_select %p7336_p11, 1, 0 }
  0x19   : > { %162 = sbr.rel (!%p50_p4) target bundleno = 60 (0x3c), region = 28  ;;  %s163_s28 = sand.u32 (%p50_p4), 1, %s7238_s16  }
  0x1a   : > { %s5875_s29 = sshll.u32 (%p50_p4), %s7246_s18, 5  ;;  %s5874_s30 = sshll.u32 (%p50_p4), %s163_s28, 8 }
  0x1b   : > { %s169_s4 = ssub.s32 (%p50_p4), 150, %s5875_s29  ;;  %s7346_s7 = scalar_lea.sflag (%p50_p4), [#allocation4], %s163_s28 }
  0x1c   : > { %p170_p13 = scmp.lt.s32.totalorder (%p50_p4), %s169_s4, 32  ;;  %s167_s8 = scalar_lea.vmem (%p50_p4), [#allocation3], %s5874_s30 }
  0x20   : > { %s10005_s4 = smov (!%p170_p13, %s169_s4), 32 }
  0x21   : > { %s7343_s5 = sshll.u32 %s10005_s4, 7 }
  0x22   : > { %s174_s6 = ssub.s32 4096, %s7343_s5 }
  0x23   : > { %175 = vsyncadd %s7346_s7, %s174_s6  ;;  %p5877_p0 = scmp.ne.s32.totalorder %s7343_s5, 0  ;;  %s5953_s9 = sshll.u32 %s7246_s18, 12 }
  0x24   : > { %s7354_s12 = scalar_lea.hbm %s9649_s0, %s5953_s9  ;;  %s181_s13 = sshll.u32 %s167_s8, 4  ;;  %s7356_s13 = int_to_ptr.vmem [resolvable:$true] %s181_s13 }
  0x25   : > { %s7140_s2 = scalar_lea.hbm %s7354_s12, %s7343_s5  ;;  %s7144_s23 = scalar_lea.hbm %s9649_s0, 19200 }
  0x26   : > { %p7141_p1 = scmp.ne.s32.totalorder %s7354_s12, %s7140_s2  ;;  %p7145_p4 = scmp.lt.u32.totalorder %s7354_s12, %s9649_s0 }
  0x27   : > { %p7146_p5 = scmp.lt.u32.totalorder %s7144_s23, %s7140_s2  ;;  %p7148_p7 = scmp.lt.u32.totalorder %s7140_s2, %s7354_s12 }
  0x28   : > { %p7142_p2 = pnand %p7141_p1, %p5877_p0 }
  0x29   : > { %p7147_p6 = por %p7146_p5, %p7145_p4 }
  0x2a   : > { %p7143_p3 = pneg %p7142_p2 }
  0x2b   : > { %p7149_p10 = por %p7148_p7, %p7147_p6 }
  0x2d   : > { %p7150_p12 = pnand %p7149_p10, %p7143_p3 }
  0x2f   : > { %7153 = shalt.err (!%p7150_p12)
}
  0x30   : > { %s7154_s30 = scalar_lea.vmem %s7356_s13, %s7343_s5  ;;  %s7252_s4 = smov [#allocation3]  }
  0x31   : > { %p7155_p13 = scmp.ne.s32.totalorder %s7356_s13, %s7154_s30  ;;  %s7158_s6 = sshll.u32 %s7252_s4, 4  ;;  %s7159_s6 = int_to_ptr.vmem [resolvable:$false] %s7158_s6 }
  0x32   : > { %s7160_s8 = scalar_lea.vmem %s7159_s6, 8192  ;;  %p7161_p11 = scmp.lt.s32.totalorder %s7356_s13, %s7159_s6 }
  0x33   : > { %p7156_p1 = pnand %p7155_p13, %p5877_p0  ;;  %p7162_p4 = scmp.lt.s32.totalorder %s7160_s8, %s7154_s30 }
  0x35   : > { %p7157_p2 = pneg %p7156_p1  ;;  %p7163_p5 = por %p7162_p4, %p7161_p11 }
  0x37   : > { %p7164_p6 = pnand %p7163_p5, %p7157_p2 }
  0x39   : > { %7167 = shalt.err (!%p7164_p6)
}
  0x3a   : > { %s7253_s9 = smov 128   ;;  %s7254_s10 = smov 8  }
  0x3b   : > { %187 = dma.hbm_to_vmem [thread:$0]  (%p5877_p0), %s7354_s12, %s7343_s5, %s7356_s13, %s7346_s7, %s7253_s9, %s7253_s9, %s7254_s10  }
  0x3c PF: > { %p5881_p3 = scmp.ge.s32.totalorder %s7250_s19, 1  ;;  %p189_p7 = scmp.lt.s32.totalorder %s7250_s19, 6 }
  0x3e   : > { %p190_p10 = pnand %p5881_p3, %p189_p7 }
  0x40   : > { %193 = sbr.rel (%p190_p10) target bundleno = 846 (0x34e), region = 32 }
  0x47   : > { %s7386_s11 = sand.u32 1, %s7234_s15  }
  0x48   : > { %s5882_s2 = sshll.u32 %s7386_s11, 8  ;;  %s196_s20 = scalar_lea.sflag [#allocation4], %s7386_s11 }
  0x49   : > { %s7390_s22 = scalar_lea.vmem [#allocation3], %s5882_s2 }
  0x4a   : > { %7221 = dma.done.wait (%p7325_p8), %s196_s20, 4096  }
  0x4b   : > { %7223 = vsyncadd (%p7325_p8), %s196_s20, 4294963200  ;;  %v280_v0 = vld [vmem:[%s9650_s1] sm:$0xff]  ;;  %v281_v1 = vld [vmem:[%s9650_s1 + $0x8] sm:$0xff]  ;;  %vm5546_vm1 = vcmask 130112   ;;  %vm5553_vm2 = vcmask 195712   ;;  %vm5560_vm3 = vcmask 261312  }
  0x4c   : > { %v7405_v2 = vld [vmem:[%s9650_s1 + $0x10] sm:$0xff]  ;;  %v297_v3 = vand.u32 4294901760, %v280_v0  ;;  %v300_v4 = vand.u32 4294901760, %v281_v1  ;;  %v7410_v5 = vld [vmem:[%s9650_s1 + $0x18] sm:$0xff]  ;;  %v7416_v7 = vld [vmem:[%s9650_s1 + $0x20] sm:$0xff]  ;;  %vm5567_vm4 = vcmask 326912  }
  0x4d   : > { %v303_v6 = vand.u32 4294901760, %v7405_v2  ;;  %v7421_v8 = vld [vmem:[%s9650_s1 + $0x28] sm:$0xff]  ;;  %v306_v9 = vand.u32 4294901760, %v7410_v5  ;;  %v309_v11 = vand.u32 4294901760, %v7416_v7  ;;  %v7437_v14 = vld [vmem:[%s9650_s1 + $0x30] sm:$0xff]  ;;  %v7442_v15 = vld [vmem:[%s9650_s1 + $0x38] sm:$0xff] }
  0x4e   : > { %v7424_v10 = vpack.c.bf16 %v300_v4, %v297_v3  ;;  %v312_v12 = vand.u32 4294901760, %v7421_v8  ;;  %v248_v16 = vld [vmem:[%s7390_s22] sm:$0xff]  ;;  %v315_v19 = vand.u32 4294901760, %v7437_v14  ;;  %v318_v20 = vand.u32 4294901760, %v7442_v15  ;;  %v7469_v22 = vld [vmem:[%s9650_s1 + $0x48] sm:$0xff]  ;;  %v7491_v29 = vld [vmem:[%s9650_s1 + $0x50] sm:$0xff] }
  0x4f   : > { %v7432_v13 = vpack.c.bf16 %v306_v9, %v303_v6  ;;  %v7449_v17 = vand.u32 4294901760, %v248_v16  ;;  %v7464_v21 = vld [vmem:[%s9650_s1 + $0x40] sm:$0xff]  ;;  %v249_v25 = vld [vmem:[%s7390_s22 + $0x8] sm:$0xff]  ;;  %v9660_v28 = vand.u32 4294901760, %v7469_v22  ;;  %v7496_v30 = vld [vmem:[%s9650_s1 + $0x58] sm:$0xff]  ;;  %v9658_v35 = vand.u32 4294901760, %v7491_v29 }
  0x50   : > { %6724 = vmatprep.subr.bf16.mxu1 %v7424_v10  ;;  %6820 = vmatprep.subr.bf16.mxu0 %v7424_v10  ;;  %v7457_v18 = vpack.c.bf16 %v312_v12, %v309_v11  ;;  %v7484_v26 = vpack.c.bf16 %v318_v20, %v315_v19  ;;  %v9661_v27 = vand.u32 4294901760, %v7464_v21  ;;  %v250_v32 = vld [vmem:[%s7390_s22 + $0x10] sm:$0xff]  ;;  %v7500_v33 = vand.u32 4294901760, %v249_v25  ;;  %v251_v34 = vld [vmem:[%s7390_s22 + $0x18] sm:$0xff]  ;;  %v7510_v37 = vld [vmem:[%s9650_s1 + $0x60] sm:$0xff]  ;;  %s5751_s7 = sld [smem:[#allocation2]] }
  0x51   : > { %6726 = vmatpush3.bf16.msra.mxu1 %v7424_v10  ;;  %6822 = vmatpush3.bf16.msra.mxu0 %v7424_v10  ;;  %v7472_v23 = vsub.f32 %v248_v16, %v7449_v17  ;;  %v9657_v36 = vand.u32 4294901760, %v7496_v30  ;;  %v7512_v39 = vsub.f32 %v280_v0, %v297_v3  ;;  %v7525_v41 = vld [vmem:[%s9650_s1 + $0x68] sm:$0xff]  ;;  %v7527_v42 = vsub.f32 %v281_v1, %v300_v4  ;;  %v252_v44 = vld [vmem:[%s7390_s22 + $0x20] sm:$0xff]  ;;  %v7538_v47 = vld [vmem:[%s9650_s1 + $0x70] sm:$0xff]  ;;  %s5954_s12 = sshll.u32 %s7242_s17, 5  ;;  %s5760_s30 = scalar_lea.sflag [#allocation5], %s7386_s11 }
  0x52   : > { %6728 = vmatprep.subr.bf16.mxu1 %v7432_v13  ;;  %6824 = vmatprep.subr.bf16.mxu0 %v7432_v13  ;;  %9740 = vst [vmem:[#allocation10_spill] sm:$0xff] %v7484_v26  ;;  %v7520_v40 = vpack.c.bf16 %v9660_v28, %v9661_v27  ;;  %v7529_v43 = vand.u32 4294901760, %v250_v32  ;;  %v7532_v45 = vand.u32 4294901760, %v251_v34  ;;  %v9656_v46 = vand.u32 4294901760, %v7510_v37  ;;  %v7543_v48 = vld [vmem:[%s9650_s1 + $0x78] sm:$0xff]  ;;  %v253_v56 = vld [vmem:[%s7390_s22 + $0x28] sm:$0xff]  ;;  %s9598_s29 = scalar_lea.hbm %s9652_s3, %s5954_s12 }
  0x53   : > { %9739 = vst [vmem:[#allocation9_spill] sm:$0xff] %v7472_v23  ;;  %v379_v24 = vand.u32 4294901760, %v7472_v23  ;;  %v7546_v49 = vsub.f32 %v249_v25, %v7500_v33  ;;  %v7554_v50 = vpack.c.bf16 %v9657_v36, %v9658_v35  ;;  %v9655_v51 = vand.u32 4294901760, %v7525_v41  ;;  %v254_v3 = vld [vmem:[%s7390_s22 + $0x30] sm:$0xff]  ;;  %v255_v4 = vld [vmem:[%s7390_s22 + $0x38] sm:$0xff]  ;;  %s7258_s17 = smov [#allocation6]  }
  0x54   : > { %9741 = vst [vmem:[#allocation11_spill] sm:$0xff] %v7520_v40  ;;  %v700_v52 = vand.u32 4294901760, %v7512_v39  ;;  %v7558_v53 = vand.u32 4294901760, %v252_v44  ;;  %v707_v54 = vand.u32 4294901760, %v7527_v42  ;;  %v7564_v55 = vsub.f32 %v250_v32, %v7529_v43  ;;  %s7172_s4 = sshll.u32 %s7258_s17, 4  ;;  %s7173_s4 = int_to_ptr.vmem [resolvable:$false] %s7172_s4 }
  0x55   : > { %6730 = vmatpush3.bf16.msra.mxu1 %v7432_v13  ;;  %6826 = vmatpush3.bf16.msra.mxu0 %v7432_v13  ;;  %v380_v31 = vsub.f32 %v7472_v23, %v379_v24  ;;  %9742 = vst [vmem:[#allocation12_spill] sm:$0xff] %v7546_v49  ;;  %9743 = vst [vmem:[#allocation13_spill] sm:$0xff] %v7554_v50  ;;  %v7570_v57 = vsub.f32 %v7405_v2, %v303_v6  ;;  %v9654_v59 = vand.u32 4294901760, %v7538_v47  ;;  %v259_v23 = vld [vmem:[%s7390_s22 + $0x58] sm:$0xff]  ;;  %vm5574_vm5 = vcmask 392512   ;;  %s7174_s6 = scalar_lea.vmem %s7173_s4, 64 }
  0x56   : > { %6732 = vmatprep.subr.bf16.mxu1 %v7457_v18  ;;  %6828 = vmatprep.subr.bf16.mxu0 %v7457_v18  ;;  %9744 = vst [vmem:[#allocation14_spill] sm:$0xff] %v7564_v55  ;;  %v7575_v58 = vsub.f32 %v7410_v5, %v306_v9  ;;  %v9653_v60 = vand.u32 4294901760, %v7543_v48  ;;  %v7580_v61 = vsub.f32 %v251_v34, %v7532_v45  ;;  %v9663_v62 = vand.u32 4294901760, %v7546_v49 }
  0x57   : > { %6515 = vmatprep.mubr.f32.mxu0 %v379_v24  ;;  %v381_v38 = vand.u32 4294901760, %v380_v31  ;;  %v7589_v63 = vpack.c.bf16 %v9655_v51, %v9656_v46  ;;  %v701_v0 = vsub.f32 %v7512_v39, %v700_v52  ;;  %v7593_v1 = vsub.f32 %v252_v44, %v7558_v53  ;;  %v256_v24 = vld [vmem:[%s7390_s22 + $0x40] sm:$0xff]  ;;  %v257_v51 = vld [vmem:[%s7390_s22 + $0x48] sm:$0xff] }
  0x58   : > { %9745 = vst [vmem:[#allocation15_spill] sm:$0xff] %v7580_v61  ;;  %v7595_v2 = vand.u32 4294901760, %v253_v56  ;;  %v708_v5 = vsub.f32 %v7527_v42, %v707_v54  ;;  %v9659_v6 = vand.u32 4294901760, %v7564_v55  ;;  %v9665_v9 = vand.u32 4294901760, %v7570_v57 }
  0x59   : > { %6734 = vmatpush3.bf16.msra.mxu1 %v7457_v18  ;;  %6830 = vmatpush3.bf16.msra.mxu0 %v7457_v18  ;;  %9746 = vst [vmem:[#allocation16_spill] sm:$0xff] %v7589_v63  ;;  %9747 = vst [vmem:[#allocation17_spill] sm:$0xff] %v7593_v1  ;;  %v9664_v16 = vand.u32 4294901760, %v7575_v58  ;;  %v7610_v25 = vpack.c.bf16 %v9653_v60, %v9654_v59  ;;  %v9662_v31 = vand.u32 4294901760, %v7580_v61  ;;  %v7630_v60 = vand.u32 4294901760, %v254_v3 }
  0x5a   : > { %6736 = vmatprep.subr.bf16.mxu1 %v7484_v26  ;;  %6832 = vmatprep.subr.bf16.mxu0 %v7484_v26  ;;  %9748 = vst [vmem:[#allocation18_spill] sm:$0xff] %v7595_v2  ;;  %v7616_v32 = vsub.f32 %v7416_v7, %v309_v11  ;;  %v7621_v34 = vsub.f32 %v7421_v8, %v312_v12  ;;  %v7632_v59 = vand.u32 4294901760, %v255_v4  ;;  %v702_v7 = vand.u32 4294901760, %v701_v0 }
  0x5b   : > { %6275 = vmatprep.mubr.f32.mxu1 %v381_v38  ;;  %9749 = vst [vmem:[#allocation19_spill] sm:$0xff] %v7610_v25  ;;  %v7626_v38 = vsub.f32 %v7546_v49, %v9663_v62  ;;  %v7628_v44 = vpack.c.bf16 %v707_v54, %v700_v52  ;;  %9750 = vst [vmem:[#allocation20_spill] sm:$0xff] %v7630_v60  ;;  %v9666_v11 = vand.u32 4294901760, %v7593_v1  ;;  %v7640_v12 = vand.u32 4294901760, %v256_v24 }
  0x5c   : > { %9751 = vst [vmem:[#allocation21_spill] sm:$0xff] %v7632_v59  ;;  %v7638_v8 = vsub.f32 %v253_v56, %v7595_v2  ;;  %v709_v52 = vand.u32 4294901760, %v708_v5  ;;  %v7648_v54 = vsub.f32 %v7564_v55, %v9659_v6  ;;  %v715_v0 = vsub.f32 %v7570_v57, %v9665_v9 }
  0x5d   : > { %6738 = vmatpush3.bf16.msra.mxu1 %v7484_v26  ;;  %6834 = vmatpush3.bf16.msra.mxu0 %v7484_v26  ;;  %9753 = vst [vmem:[#allocation23_spill] sm:$0xff] %v7640_v12  ;;  %v722_v56 = vsub.f32 %v7575_v58, %v9664_v16  ;;  %v7659_v46 = vsub.f32 %v7580_v61, %v9662_v31  ;;  %v728_v5 = vand.u32 4294901760, %v7616_v32  ;;  %v735_v36 = vand.u32 4294901760, %v7621_v34 }
  0x5e   : > { %6740 = vmatprep.subr.bf16.mxu1 %v7520_v40  ;;  %6836 = vmatprep.subr.bf16.mxu0 %v7520_v40  ;;  %9752 = vst [vmem:[#allocation22_spill] sm:$0xff] %v7638_v8  ;;  %v7666_v35 = vsub.f32 %v7437_v14, %v315_v19  ;;  %v7669_v6 = vsub.f32 %v254_v3, %v7630_v60  ;;  %v7674_v27 = vand.u32 4294901760, %v257_v51  ;;  %v391_v14 = vand.u32 4294901760, %v7626_v38  ;;  %v258_v38 = vld [vmem:[%s7390_s22 + $0x50] sm:$0xff] }
  0x5f   : > { %v7672_v28 = vsub.f32 %v255_v4, %v7632_v59  ;;  %v7679_v31 = vsub.f32 %v7442_v15, %v318_v20  ;;  %v7687_v19 = vsub.f32 %v7593_v1, %v9666_v11  ;;  %v7691_v4 = vsub.f32 %v256_v24, %v7640_v12 }
  0x60   : > { %9754 = vst [vmem:[#allocation24_spill] sm:$0xff] %v7669_v6  ;;  %9756 = vst [vmem:[#allocation26_spill] sm:$0xff] %v7674_v27  ;;  %v6755_v15 = vpack.c.bf16 %v709_v52, %v702_v7  ;;  %v401_v20 = vand.u32 4294901760, %v7648_v54  ;;  %v716_v62 = vand.u32 4294901760, %v715_v0  ;;  %v723_v16 = vand.u32 4294901760, %v722_v56 }
  0x61   : > { %6742 = vmatpush3.bf16.msra.mxu1 %v7520_v40  ;;  %6838 = vmatpush3.bf16.msra.mxu0 %v7520_v40  ;;  %9755 = vst [vmem:[#allocation25_spill] sm:$0xff] %v7672_v28  ;;  %9757 = vst [vmem:[#allocation27_spill] sm:$0xff] %v7691_v4  ;;  %v729_v9 = vsub.f32 %v7616_v32, %v728_v5  ;;  %v736_v11 = vsub.f32 %v7621_v34, %v735_v36  ;;  %v421_v0 = vand.u32 4294901760, %v7687_v19  ;;  %v261_v40 = vld [vmem:[%s7390_s22 + $0x68] sm:$0xff]  ;;  %vm5581_vm6 = vcmask 458112  }
  0x62   : > { %6744 = vmatprep.subr.bf16.mxu1 %v7554_v50  ;;  %6840 = vmatprep.subr.bf16.mxu0 %v7554_v50  ;;  %v7707_v54 = vsub.f32 %v257_v51, %v7674_v27  ;;  %v9759_v56 = vand.u32 4294901760, %v7638_v8  ;;  %v7718_v3 = vand.u32 4294901760, %v258_v38  ;;  %v6759_v51 = vpack.c.bf16 %v723_v16, %v716_v62 }
  0x63   : > { %v9761_v52 = vand.u32 4294901760, %v7570_v57  ;;  %v9762_v7 = vand.u32 4294901760, %v7575_v58  ;;  %v7725_v27 = vand.u32 4294901760, %v259_v23  ;;  %v737_v12 = vand.u32 4294901760, %v736_v11 }
  0x64   : > { %9758 = vst [vmem:[#allocation28_spill] sm:$0xff] %v7707_v54  ;;  %v7715_v24 = vsub.f32 %v7638_v8, %v9759_v56  ;;  %9760 = vst [vmem:[#allocation29_spill] sm:$0xff] %v7718_v3  ;;  %v730_v56 = vand.u32 4294901760, %v729_v9  ;;  %v9764_v26 = vand.u32 4294901760, %v7679_v31  ;;  %v9765_v16 = vand.u32 4294901760, %v7546_v49 }
  0x65   : > { %6746 = vmatpush3.bf16.msra.mxu1 %v7554_v50  ;;  %6842 = vmatpush3.bf16.msra.mxu0 %v7554_v50  ;;  %v411_v50 = vand.u32 4294901760, %v7659_v46  ;;  %v9763_v46 = vand.u32 4294901760, %v7666_v35  ;;  %v9767_v60 = vand.u32 4294901760, %v7672_v28  ;;  %v9772_v11 = vand.u32 4294901760, %v7469_v22 }
  0x66   : > { %6748 = vmatprep.subr.bf16.mxu1 %v7589_v63  ;;  %6844 = vmatprep.subr.bf16.mxu0 %v7589_v63  ;;  %v750_v62 = vsub.f32 %v7679_v31, %v9764_v26  ;;  %v9769_v26 = vand.u32 4294901760, %v7691_v4  ;;  %vm5588_vm7 = vcmask 523712   ;;  %vm5595_vm8 = vcmask 589312  }
  0x67   : > { %v743_v59 = vsub.f32 %v7666_v35, %v9763_v46  ;;  %v7744_v9 = vsub.f32 %v7672_v28, %v9767_v60  ;;  %v9768_v46 = vand.u32 4294901760, %v7464_v21  ;;  %v7761_v60 = vand.u32 4294901760, %v261_v40 }
  0x68   : > { %v7767_v49 = vsub.f32 %v7469_v22, %v9772_v11  ;;  %v751_v22 = vand.u32 4294901760, %v750_v62  ;;  %v9776_v11 = vand.u32 4294901760, %v7580_v61  ;;  %v263_v62 = vld [vmem:[%s7390_s22 + $0x78] sm:$0xff]  ;;  %v9782_v61 = vand.u32 4294901760, %v7679_v31 }
  0x69   : > { %6750 = vmatpush3.bf16.msra.mxu1 %v7589_v63  ;;  %6846 = vmatpush3.bf16.msra.mxu0 %v7589_v63  ;;  %v260_v63 = vld [vmem:[%s7390_s22 + $0x60] sm:$0xff]  ;;  %v7750_v2 = vsub.f32 %v7464_v21, %v9768_v46  ;;  %9771 = vst [vmem:[#allocation31_spill] sm:$0xff] %v7761_v60  ;;  %v9773_v21 = vand.u32 4294901760, %v7564_v55  ;;  %vm5602_vm9 = vcmask 654912   ;;  %vm5609_vm10 = vcmask 720512  }
  0x6a   : > { %6752 = vmatprep.subr.bf16.mxu1 %v7610_v25  ;;  %6848 = vmatprep.subr.bf16.mxu0 %v7610_v25  ;;  %v7727_v19 = vand.u32 4294901760, %v260_v63  ;;  %vm5616_vm11 = vcmask 786112   ;;  %vm5623_vm12 = vcmask 851712   ;;  %vm5630_vm13 = vcmask 917312  }
  0x6b   : > { %vm5637_vm14 = vcmask 982912   ;;  %vm5644_vm15 = vcmask 1048512  }
  0x6c   : > { %v7775_v46 = vsub.f32 %v260_v63, %v7727_v19 }
  0x6d   : > { %6754 = vmatpush3.bf16.msra.mxu1 %v7610_v25  ;;  %6850 = vmatpush3.bf16.msra.mxu0 %v7610_v25  ;;  %v6855_v25 = vpack.c.bf16 %v9762_v7, %v9761_v52  ;;  %v9766_v7 = vand.u32 4294901760, %v7669_v6 }
  0x6e   : > { %6756 = vmatprep.subr.bf16.mxu1 %v6755_v15  ;;  %6852 = vmatprep.subr.bf16.mxu0 %v7628_v44  ;;  %9775 = vst [vmem:[#allocation33_spill] sm:$0xff] %v7775_v46 }
  0x6f   : > { %v440_v52 = vsub.f32 %v7669_v6, %v9766_v7  ;;  %v262_v7 = vld [vmem:[%s7390_s22 + $0x70] sm:$0xff] }
  0x70   : > { %6276 = vmatmul.mubr.f32.vlgmr.msra.gmra.mrb[0].mxu1 %v391_v14  ;;  %6516 = vmatmul.mubr.f32.vlgmr.msra.gmra.mrb[0].mxu0 %v9765_v16  ;;  %v7756_v14 = vsub.f32 %v7691_v4, %v9769_v26  ;;  %v7759_v16 = vsub.f32 %v258_v38, %v7718_v3  ;;  %v756_v38 = vand.u32 4294901760, %v7750_v2  ;;  %v6763_v26 = vpack.c.bf16 %v737_v12, %v730_v56 }
  0x71   : > { %6758 = vmatpush3.bf16.msra.mxu1 %v6755_v15  ;;  %6854 = vmatpush3.bf16.msra.mxu0 %v7628_v44  ;;  %v6859_v44 = vpack.c.bf16 %v735_v36, %v728_v5  ;;  %v7772_v15 = vsub.f32 %v259_v23, %v7725_v27  ;;  %v744_v3 = vand.u32 4294901760, %v743_v59  ;;  %v431_v23 = vand.u32 4294901760, %v7715_v24 }
  0x72   : > { %9770 = vst [vmem:[#allocation30_spill] sm:$0xff] %v7759_v16  ;;  %6278 = vmatprep.mubr.f32.mxu1 %v401_v20  ;;  %6518 = vmatprep.mubr.f32.mxu0 %v9773_v21  ;;  %v763_v20 = vand.u32 4294901760, %v7767_v49  ;;  %v441_v36 = vand.u32 4294901760, %v440_v52  ;;  %v7782_v63 = vand.u32 4294901760, %v262_v7  ;;  %v757_v5 = vsub.f32 %v7750_v2, %v756_v38 }
  0x73   : > { %9774 = vst [vmem:[#allocation32_spill] sm:$0xff] %v7772_v15  ;;  %6760 = vmatprep.subr.bf16.mxu1 %v6759_v51  ;;  %6856 = vmatprep.subr.bf16.mxu0 %v6855_v25  ;;  %v9778_v12 = vand.u32 4294901760, %v7593_v1  ;;  %v9779_v59 = vand.u32 4294901760, %v7707_v54  ;;  %v7794_v24 = vsub.f32 %v261_v40, %v7761_v60  ;;  %v461_v21 = vand.u32 4294901760, %v7756_v14  ;;  %v265_v1 = vld [vmem:[%s7390_s22 + $0x88] sm:$0xff] }
  0x74   : > { %6279 = vmatmul.mubr.f32.gmra.mrb[2].mxu1 %v411_v50  ;;  %6519 = vmatmul.mubr.f32.gmra.mrb[2].mxu0 %v9776_v11  ;;  %9777 = vst [vmem:[#allocation34_spill] sm:$0xff] %v7782_v63  ;;  %v764_v52 = vsub.f32 %v7767_v49, %v763_v20  ;;  %v6767_v40 = vpack.c.bf16 %v751_v22, %v744_v3  ;;  %v9781_v56 = vand.u32 4294901760, %v7666_v35  ;;  %v266_v11 = vld [vmem:[%s7390_s22 + $0x90] sm:$0xff]  ;;  %v9784_v60 = vand.u32 4294901760, %v7491_v29 }
  0x75   : > { %6281 = vmatprep.mubr.f32.mxu1 %v421_v0  ;;  %6521 = vmatprep.mubr.f32.mxu0 %v9778_v12  ;;  %v7790_v50 = vsub.f32 %v7707_v54, %v9779_v59  ;;  %9780 = vst [vmem:[#allocation35_spill] sm:$0xff] %v7794_v24  ;;  %v451_v0 = vand.u32 4294901760, %v7744_v9  ;;  %v264_v59 = vld [vmem:[%s7390_s22 + $0x80] sm:$0xff]  ;;  %v9783_v9 = vand.u32 4294901760, %v7638_v8  ;;  %v7811_v14 = vsub.f32 %v262_v7, %v7782_v63 }
  0x76   : > { %6762 = vmatpush3.bf16.msra.mxu1 %v6759_v51  ;;  %6858 = vmatpush3.bf16.msra.mxu0 %v6855_v25  ;;  %v6863_v51 = vpack.c.bf16 %v9782_v61, %v9781_v56  ;;  %v758_v25 = vand.u32 4294901760, %v757_v5  ;;  %v765_v55 = vand.u32 4294901760, %v764_v52  ;;  %v7813_v12 = vand.u32 4294901760, %v263_v62 }
  0x77   : > { %6764 = vmatprep.subr.bf16.mxu1 %v6763_v26  ;;  %6860 = vmatprep.subr.bf16.mxu0 %v6859_v44  ;;  %v7819_v3 = vsub.f32 %v7491_v29, %v9784_v60  ;;  %v9785_v22 = vand.u32 4294901760, %v7496_v30  ;;  %v9787_v7 = vand.u32 4294901760, %v7759_v16  ;;  %v7832_v52 = vand.u32 4294901760, %v264_v59 }
  0x78   : > { %6282 = vmatmul.mubr.f32.gmra.mrb[4].mxu1 %v431_v23  ;;  %6522 = vmatmul.mubr.f32.gmra.mrb[4].mxu0 %v9783_v9  ;;  %v9786_v23 = vand.u32 4294901760, %v7669_v6  ;;  %v7834_v29 = vand.u32 4294901760, %v265_v1  ;;  %v471_v60 = vand.u32 4294901760, %v7790_v50  ;;  %v6771_v56 = vpack.c.bf16 %v765_v55, %v758_v25 }
  0x79   : > { %v7824_v61 = vsub.f32 %v7496_v30, %v9785_v22  ;;  %6284 = vmatprep.mubr.f32.mxu1 %v441_v36  ;;  %v480_v5 = vsub.f32 %v7759_v16, %v9787_v7  ;;  %v9788_v30 = vand.u32 4294901760, %v7772_v15  ;;  %v770_v9 = vand.u32 4294901760, %v7819_v3 }
  0x7a   : > { %6524 = vmatprep.mubr.f32.mxu0 %v9786_v23  ;;  %6766 = vmatpush3.bf16.msra.mxu1 %v6763_v26  ;;  %v9789_v23 = vand.u32 4294901760, %v7775_v46  ;;  %v6867_v6 = vpack.c.bf16 %v763_v20, %v756_v38  ;;  %v7847_v50 = vand.u32 4294901760, %v266_v11  ;;  %v9790_v26 = vand.u32 4294901760, %v7672_v28 }
  0x7b   : > { %6862 = vmatpush3.bf16.msra.mxu0 %v6859_v44  ;;  %v490_v36 = vsub.f32 %v7772_v15, %v9788_v30  ;;  %v777_v22 = vand.u32 4294901760, %v7824_v61  ;;  %6768 = vmatprep.subr.bf16.mxu1 %v6767_v40  ;;  %v267_v44 = vld [vmem:[%s7390_s22 + $0x98] sm:$0xff]  ;;  %v7854_v8 = vsub.f32 %v263_v62, %v7813_v12  ;;  %v9791_v55 = vand.u32 4294901760, %v7691_v4 }
  0x7c   : > { %v7845_v7 = vsub.f32 %v7775_v46, %v9789_v23  ;;  %6864 = vmatprep.subr.bf16.mxu0 %v6863_v51  ;;  %6285 = vmatmul.mubr.f32.gmra.mrb[6].mxu1 %v451_v0  ;;  %v771_v23 = vsub.f32 %v7819_v3, %v770_v9  ;;  %v481_v38 = vand.u32 4294901760, %v480_v5  ;;  %v9792_v20 = vand.u32 4294901760, %v7794_v24 }
  0x7d   : > { %6525 = vmatmul.mubr.f32.gmra.mrb[6].mxu0 %v9790_v26  ;;  %v778_v63 = vsub.f32 %v7824_v61, %v777_v22  ;;  %6287 = vmatprep.mubr.f32.mxu1 %v461_v21  ;;  %v7866_v25 = vsub.f32 %v264_v59, %v7832_v52  ;;  %v7869_v62 = vsub.f32 %v265_v1, %v7834_v29  ;;  %v7871_v26 = vand.u32 4294901760, %v267_v44  ;;  %v268_v21 = vld [vmem:[%s7390_s22 + $0xa0] sm:$0xff]  ;;  %v269_v1 = vld [vmem:[%s7390_s22 + $0xa8] sm:$0xff] }
  0x7e   : > { %6527 = vmatprep.mubr.f32.mxu0 %v9791_v55  ;;  %v7863_v0 = vsub.f32 %v7794_v24, %v9792_v20  ;;  %6770 = vmatpush3.bf16.msra.mxu1 %v6767_v40  ;;  %v772_v30 = vand.u32 4294901760, %v771_v23  ;;  %v9793_v5 = vand.u32 4294901760, %v7510_v37  ;;  %v491_v20 = vand.u32 4294901760, %v490_v36 }
  0x7f   : > { %6866 = vmatpush3.bf16.msra.mxu0 %v6863_v51  ;;  %v779_v55 = vand.u32 4294901760, %v778_v63  ;;  %6772 = vmatprep.subr.bf16.mxu1 %v6771_v56  ;;  %v7880_v59 = vsub.f32 %v266_v11, %v7847_v50  ;;  %v6871_v40 = vpack.c.bf16 %v777_v22, %v770_v9  ;;  %v9794_v51 = vand.u32 4294901760, %v7525_v41 }
  0x80   : > { %v7877_v4 = vsub.f32 %v7510_v37, %v9793_v5  ;;  %6868 = vmatprep.subr.bf16.mxu0 %v6867_v6  ;;  %6288 = vmatmul.mubr.f32.gmra.mrb[8].mxu1 %v471_v60  ;;  %v9795_v63 = vand.u32 4294901760, %v7707_v54  ;;  %v9796_v37 = vand.u32 4294901760, %v7811_v14  ;;  %v9797_v9 = vand.u32 4294901760, %v7759_v16 }
  0x81   : > { %v7886_v28 = vsub.f32 %v7525_v41, %v9794_v51  ;;  %v6775_v5 = vpack.c.bf16 %v779_v55, %v772_v30  ;;  %6290 = vmatprep.mubr.f32.mxu1 %v481_v38  ;;  %v501_v41 = vand.u32 4294901760, %v7845_v7  ;;  %v7899_v22 = vand.u32 4294901760, %v268_v21  ;;  %v270_v51 = vld [vmem:[%s7390_s22 + $0xb0] sm:$0xff] }
  0x82   : > { %6528 = vmatmul.mubr.f32.gmra.mrb[8].mxu0 %v9795_v63  ;;  %v520_v36 = vsub.f32 %v7811_v14, %v9796_v37  ;;  %v784_v11 = vand.u32 4294901760, %v7877_v4  ;;  %6774 = vmatpush3.bf16.msra.mxu1 %v6771_v56  ;;  %v7905_v30 = vsub.f32 %v267_v44, %v7871_v26  ;;  %v7907_v38 = vand.u32 4294901760, %v269_v1 }
  0x83   : > { %6530 = vmatprep.mubr.f32.mxu0 %v9797_v9  ;;  %9798 = vst [vmem:[#allocation36_spill] sm:$0xff] %v7899_v22  ;;  %v791_v63 = vand.u32 4294901760, %v7886_v28  ;;  %6870 = vmatpush3.bf16.msra.mxu0 %v6867_v6  ;;  %v511_v7 = vand.u32 4294901760, %v7863_v0  ;;  %v9800_v56 = vand.u32 4294901760, %v7772_v15  ;;  %v9801_v44 = vand.u32 4294901760, %v7854_v8  ;;  %v271_v0 = vld [vmem:[%s7390_s22 + $0xb8] sm:$0xff] }
  0x84   : > { %9799 = vst [vmem:[#allocation37_spill] sm:$0xff] %v7907_v38  ;;  %v785_v55 = vsub.f32 %v7877_v4, %v784_v11  ;;  %6776 = vmatprep.subr.bf16.mxu1 %v6775_v5  ;;  %6872 = vmatprep.subr.bf16.mxu0 %v6871_v40  ;;  %v521_v6 = vand.u32 4294901760, %v520_v36  ;;  %v7918_v16 = vand.u32 4294901760, %v270_v51  ;;  %v9803_v9 = vand.u32 4294901760, %v7775_v46 }
  0x85   : > { %v792_v60 = vsub.f32 %v7886_v28, %v791_v63  ;;  %v6875_v23 = vpack.c.bf16 %v791_v63, %v784_v11  ;;  %6291 = vmatmul.mubr.f32.gmra.mrb[10].mxu1 %v491_v20  ;;  %v530_v37 = vsub.f32 %v7854_v8, %v9801_v44  ;;  %v9804_v11 = vand.u32 4294901760, %v7866_v25 }
  0x86   : > { %6531 = vmatmul.mubr.f32.gmra.mrb[10].mxu0 %v9800_v56  ;;  %9802 = vst [vmem:[#allocation38_spill] sm:$0xff] %v7918_v16  ;;  %v786_v54 = vand.u32 4294901760, %v785_v55  ;;  %6293 = vmatprep.mubr.f32.mxu1 %v501_v41  ;;  %v7927_v63 = vsub.f32 %v268_v21, %v7899_v22  ;;  %v9805_v56 = vand.u32 4294901760, %v7538_v47  ;;  %v9806_v15 = vand.u32 4294901760, %v7869_v62 }
  0x87   : > { %6533 = vmatprep.mubr.f32.mxu0 %v9803_v9  ;;  %v540_v20 = vsub.f32 %v7866_v25, %v9804_v11  ;;  %v793_v36 = vand.u32 4294901760, %v792_v60  ;;  %v7937_v9 = vsub.f32 %v269_v1, %v7907_v38  ;;  %6778 = vmatpush3.bf16.msra.mxu1 %v6775_v5  ;;  %v272_v11 = vld [vmem:[%s7390_s22 + $0xc0] sm:$0xff]  ;;  %v9807_v21 = vand.u32 4294901760, %v7543_v48 }
  0x88   : > { %v797_v44 = vsub.f32 %v7538_v47, %v9805_v56  ;;  %v550_v55 = vsub.f32 %v7869_v62, %v9806_v15  ;;  %6874 = vmatpush3.bf16.msra.mxu0 %v6871_v40  ;;  %v9808_v46 = vand.u32 4294901760, %v7880_v59  ;;  %v7946_v56 = vand.u32 4294901760, %v271_v0 }
  0x89   : > { %v804_v60 = vsub.f32 %v7543_v48, %v9807_v21  ;;  %v6779_v15 = vpack.c.bf16 %v793_v36, %v786_v54  ;;  %6876 = vmatprep.subr.bf16.mxu0 %v6875_v23  ;;  %6294 = vmatmul.mubr.f32.gmra.mrb[12].mxu1 %v511_v7  ;;  %v9809_v1 = vand.u32 4294901760, %v7794_v24  ;;  %v531_v40 = vand.u32 4294901760, %v530_v37  ;;  %v273_v36 = vld [vmem:[%s7390_s22 + $0xc8] sm:$0xff]  ;;  %v274_v37 = vld [vmem:[%s7390_s22 + $0xd0] sm:$0xff] }
  0x8a   : > { %v560_v47 = vsub.f32 %v7880_v59, %v9808_v46  ;;  %v798_v41 = vand.u32 4294901760, %v797_v44  ;;  %v7951_v5 = vsub.f32 %v270_v51, %v7918_v16  ;;  %6296 = vmatprep.mubr.f32.mxu1 %v521_v6  ;;  %v9810_v21 = vand.u32 4294901760, %v7811_v14 }
  0x8b   : > { %6534 = vmatmul.mubr.f32.gmra.mrb[12].mxu0 %v9809_v1  ;;  %v805_v48 = vand.u32 4294901760, %v804_v60  ;;  %v541_v46 = vand.u32 4294901760, %v540_v20  ;;  %v7956_v54 = vand.u32 4294901760, %v272_v11  ;;  %v551_v22 = vand.u32 4294901760, %v550_v55  ;;  %6780 = vmatprep.subr.bf16.mxu1 %v6779_v15 }
  0x8c   : > { %6536 = vmatprep.mubr.f32.mxu0 %v9810_v21  ;;  %v799_v7 = vsub.f32 %v797_v44, %v798_v41  ;;  %6878 = vmatpush3.bf16.msra.mxu0 %v6875_v23  ;;  %v561_v16 = vand.u32 4294901760, %v560_v47  ;;  %v9811_v6 = vand.u32 4294901760, %v7905_v30  ;;  %v7965_v21 = vsub.f32 %v271_v0, %v7946_v56 }
  0x8d   : > { %v806_v51 = vsub.f32 %v804_v60, %v805_v48  ;;  %v6879_v1 = vpack.c.bf16 %v805_v48, %v798_v41  ;;  %6782 = vmatpush3.bf16.msra.mxu1 %v6779_v15  ;;  %v9813_v55 = vand.u32 4294901760, %v7854_v8  ;;  %v9713_v23 = vand.u32 4294901760, %v7951_v5 }
  0x8e   : > { %v570_v20 = vsub.f32 %v7905_v30, %v9811_v6  ;;  %9812 = vst [vmem:[#allocation39_spill] sm:$0xff] %v7965_v21  ;;  %v800_v38 = vand.u32 4294901760, %v799_v7  ;;  %6297 = vmatmul.mubr.f32.gmra.mrb[14].mxu1 %v531_v40  ;;  %v7970_v24 = vand.u32 4294901760, %v273_v36  ;;  %v7974_v47 = vpack.c.bf16 %v7575_v58, %v7570_v57  ;;  %v275_v6 = vld [vmem:[%s7390_s22 + $0xd8] sm:$0xff] }
  0x8f   : > { %6537 = vmatmul.mubr.f32.gmra.mrb[14].mxu0 %v9813_v55  ;;  %v807_v41 = vand.u32 4294901760, %v806_v51  ;;  %6299 = vmatprep.mubr.f32.mxu1 %v541_v46  ;;  %v9814_v0 = vand.u32 4294901760, %v7866_v25  ;;  %v9815_v15 = vand.u32 4294901760, %v7927_v63  ;;  %v7982_v48 = vsub.f32 %v272_v11, %v7956_v54  ;;  %v276_v46 = vld [vmem:[%s7390_s22 + $0xe0] sm:$0xff] }
  0x90   : > { %v7984_v7 = vand.u32 4294901760, %v274_v37  ;;  %v7989_v51 = vpack.c.bf16 %v7621_v34, %v7616_v32  ;;  %v9817_v57 = vand.u32 4294901760, %v7937_v9  ;;  %6880 = vmatprep.subr.bf16.mxu0 %v6879_v1  ;;  %v8001_v11 = vpack.c.bf16 %v7767_v49, %v7750_v2 }
  0x91   : > { %6539 = vmatprep.mubr.f32.mxu0 %v9814_v0  ;;  %v580_v40 = vsub.f32 %v7927_v63, %v9815_v15  ;;  %9816 = vst [vmem:[#allocation40_spill] sm:$0xff] %v7982_v48  ;;  %v6783_v55 = vpack.c.bf16 %v807_v41, %v800_v38  ;;  %v7997_v0 = vpack.c.bf16 %v7679_v31, %v7666_v35  ;;  %v609_v15 = vand.u32 4294901760, %v7965_v21 }
  0x92   : > { %v590_v58 = vsub.f32 %v7937_v9, %v9817_v57  ;;  %6882 = vmatpush3.bf16.msra.mxu0 %v6879_v1  ;;  %v8006_v32 = vpack.c.bf16 %v7824_v61, %v7819_v3  ;;  %v8010_v34 = vpack.c.bf16 %v7886_v28, %v7877_v4  ;;  %v8012_v38 = vpack.c.bf16 %v804_v60, %v797_v44  ;;  %v277_v60 = vld [vmem:[%s7390_s22 + $0xe8] sm:$0xff]  ;;  %v278_v1 = vld [vmem:[%s7390_s22 + $0xf0] sm:$0xff] }
  0x93   : > { %6300 = vmatmul.mubr.f32.gmra.mrb[16].mxu1 %v551_v22  ;;  %v9818_v35 = vand.u32 4294901760, %v7869_v62  ;;  %v571_v49 = vand.u32 4294901760, %v570_v20  ;;  %v600_v2 = vsub.f32 %v7951_v5, %v9713_v23  ;;  %v8020_v31 = vsub.f32 %v273_v36, %v7970_v24  ;;  %6784 = vmatprep.subr.bf16.mxu1 %v6783_v55 }
  0x94   : > { %v8022_v3 = vand.u32 4294901760, %v275_v6  ;;  %6302 = vmatprep.mubr.f32.mxu1 %v561_v16  ;;  %v9820_v28 = vand.u32 4294901760, %v7880_v59  ;;  %v581_v4 = vand.u32 4294901760, %v580_v40  ;;  %v619_v61 = vand.u32 4294901760, %v7982_v48  ;;  %6884 = vmatprep.subr.bf16.mxu0 %v7424_v10 }
  0x95   : > { %6540 = vmatmul.mubr.f32.gmra.mrb[16].mxu0 %v9818_v35  ;;  %9819 = vst [vmem:[#allocation41_spill] sm:$0xff] %v8020_v31  ;;  %v8028_v22 = vsub.f32 %v274_v37, %v7984_v7  ;;  %v8030_v44 = vand.u32 4294901760, %v276_v46  ;;  %v8036_v36 = vpack.c.bf16 %v7527_v42, %v7512_v39  ;;  %v591_v16 = vand.u32 4294901760, %v590_v58  ;;  %6786 = vmatpush3.bf16.msra.mxu1 %v6783_v55 }
  0x96   : > { %6542 = vmatprep.mubr.f32.mxu0 %v9820_v28  ;;  %v610_v20 = vsub.f32 %v7965_v21, %v609_v15  ;;  %v9822_v37 = vand.u32 4294901760, %v7905_v30  ;;  %v601_v41 = vand.u32 4294901760, %v600_v2  ;;  %v629_v40 = vand.u32 4294901760, %v8020_v31  ;;  %v279_v2 = vld [vmem:[%s7390_s22 + $0xf8] sm:$0xff]  ;;  %s5883_s22 = sshll.u32 %s7386_s11, 1 }
  0x97   : > { %9821 = vst [vmem:[#allocation42_spill] sm:$0xff] %v8028_v22  ;;  %6303 = vmatmul.mubr.f32.gmra.mrb[18].mxu1 %v571_v49  ;;  %v8044_v57 = vsub.f32 %v275_v6, %v8022_v3  ;;  %v8046_v35 = vand.u32 4294901760, %v277_v60  ;;  %v9823_v39 = vand.u32 4294901760, %v7927_v63  ;;  %v620_v42 = vsub.f32 %v7982_v48, %v619_v61  ;;  %6788 = vmatprep.subr.bf16.mxu1 %v8036_v36  ;;  %s9492_s5 = scalar_lea.vmem [#allocation6], %s5883_s22 }
  0x98   : > { %6305 = vmatprep.mubr.f32.mxu1 %v581_v4  ;;  %v639_v58 = vand.u32 4294901760, %v8028_v22  ;;  %v8053_v55 = vsub.f32 %v276_v46, %v8030_v44  ;;  %v8055_v49 = vand.u32 4294901760, %v278_v1  ;;  %v611_v6 = vand.u32 4294901760, %v610_v20  ;;  %s5774_s13 = sshll.u32 %s9492_s5, 4  ;;  %s9600_s13 = int_to_ptr.vmem [resolvable:$true] %s5774_s13 }
  0x99   : > { %6543 = vmatmul.mubr.f32.gmra.mrb[18].mxu0 %v9822_v37  ;;  %v9824_v28 = vand.u32 4294901760, %v7937_v9  ;;  %v630_v4 = vsub.f32 %v8020_v31, %v629_v40  ;;  %v649_v37 = vand.u32 4294901760, %v8044_v57  ;;  %v8066_v23 = vand.u32 4294901760, %v279_v2  ;;  %s7168_s24 = scalar_lea.vmem %s9600_s13, 32  ;;  %p7175_p12 = scmp.lt.s32.totalorder %s9600_s13, %s7173_s4 }
  0x9a   : > { %6545 = vmatprep.mubr.f32.mxu0 %v9823_v39  ;;  %v8064_v39 = vsub.f32 %v277_v60, %v8046_v35  ;;  %v9825_v46 = vand.u32 4294901760, %v7951_v5  ;;  %v621_v48 = vand.u32 4294901760, %v620_v42  ;;  %v640_v20 = vsub.f32 %v8028_v22, %v639_v58  ;;  %p7169_p8 = scmp.ne.s32.totalorder %s9600_s13, %s7168_s24  ;;  %p7176_p13 = scmp.lt.s32.totalorder %s7174_s6, %s7168_s24 }
  0x9b   : > { %6306 = vmatmul.mubr.f32.gmra.mrb[20].mxu1 %v591_v16  ;;  %v659_v16 = vand.u32 4294901760, %v8053_v55  ;;  %v631_v31 = vand.u32 4294901760, %v630_v4  ;;  %v650_v60 = vsub.f32 %v8044_v57, %v649_v37 }
  0x9c   : > { %6308 = vmatprep.mubr.f32.mxu1 %v601_v41  ;;  %v669_v21 = vand.u32 4294901760, %v8064_v39  ;;  %v8078_v41 = vsub.f32 %v279_v2, %v8066_v23  ;;  %v641_v42 = vand.u32 4294901760, %v640_v20  ;;  %p7170_p11 = pnand %p7169_p8, %p7329_p9  ;;  %p7177_p1 = por %p7176_p13, %p7175_p12 }
  0x9d   : > { %6546 = vmatmul.mubr.f32.gmra.mrb[20].mxu0 %v9824_v28  ;;  %v8073_v28 = vsub.f32 %v278_v1, %v8055_v49  ;;  %v651_v1 = vand.u32 4294901760, %v650_v60  ;;  %v9843_v60 = vld [vmem:[#allocation12_spill] sm:$0xff] }
  0x9e   : > { %6548 = vmatprep.mubr.f32.mxu0 %v9825_v46  ;;  %v660_v46 = vsub.f32 %v8053_v55, %v659_v16  ;;  %p7171_p0 = pneg %p7170_p11 }
  0x9f   : > { %6309 = vmatmul.mubr.f32.gmra.mrb[22].mxu1 %v611_v6  ;;  %v679_v22 = vand.u32 4294901760, %v8073_v28  ;;  %v689_v6 = vand.u32 4294901760, %v8078_v41 }
  0xa0   : > { %6311 = vmatprep.mubr.f32.mxu1 %v621_v48  ;;  %v661_v4 = vand.u32 4294901760, %v660_v46  ;;  %v9845_v46 = vld [vmem:[#allocation15_spill] sm:$0xff]  ;;  %p7178_p2 = pnand %p7177_p1, %p7171_p0 }
  0xa1   : > { %6549 = vmatmul.mubr.f32.gmra.mrb[22].mxu0 %v609_v15  ;;  %v670_v15 = vsub.f32 %v8064_v39, %v669_v21  ;;  %v680_v2 = vsub.f32 %v8073_v28, %v679_v22 }
  0xa2   : > { %6551 = vmatprep.mubr.f32.mxu0 %v619_v61  ;;  %v690_v61 = vsub.f32 %v8078_v41, %v689_v6 }
  0xa3   : > { %6312 = vmatmul.mubr.f32.gmra.mrb[24].mxu1 %v631_v31  ;;  %v671_v48 = vand.u32 4294901760, %v670_v15  ;;  %v681_v20 = vand.u32 4294901760, %v680_v2  ;;  %v9847_v15 = vld [vmem:[#allocation22_spill] sm:$0xff]  ;;  %v9855_v2 = vld [vmem:[#allocation35_spill] sm:$0xff] }
  0xa4   : > { %6314 = vmatprep.mubr.f32.mxu1 %v641_v42  ;;  %v691_v31 = vand.u32 4294901760, %v690_v61  ;;  %v9844_v42 = vld [vmem:[#allocation14_spill] sm:$0xff] }
  0xa5   : > { %6552 = vmatmul.mubr.f32.gmra.mrb[24].mxu0 %v629_v40  ;;  %v9836_v40 = vld [vmem:[#allocation31_spill] sm:$0xff] }
  0xa6   : > { %6554 = vmatprep.mubr.f32.mxu0 %v639_v58  ;;  %v9837_v58 = vld [vmem:[#allocation34_spill] sm:$0xff] }
  0xa7   : > { %6315 = vmatmul.mubr.f32.gmra.mrb[26].mxu1 %v651_v1  ;;  %v9846_v1 = vld [vmem:[#allocation17_spill] sm:$0xff] }
  0xa8   : > { %6317 = vmatprep.mubr.f32.mxu1 %v661_v4  ;;  %v9854_v4 = vld [vmem:[#allocation33_spill] sm:$0xff] }
  0xa9   : > { %6555 = vmatmul.mubr.f32.gmra.mrb[26].mxu0 %v649_v37  ;;  %v9840_v37 = vld [vmem:[#allocation37_spill] sm:$0xff] }
  0xaa   : > { %6557 = vmatprep.mubr.f32.mxu0 %v659_v16  ;;  %v9842_v16 = vld [vmem:[#allocation9_spill] sm:$0xff] }
  0xab   : > { %6318 = vmatmul.mubr.f32.gmra.mrb[28].mxu1 %v671_v48 }
  0xac   : > { %6320 = vmatprep.mubr.f32.mxu1 %v681_v20 }
  0xad   : > { %6558 = vmatmul.mubr.f32.gmra.mrb[28].mxu0 %v669_v21  ;;  %v9827_v21 = vld [vmem:[#allocation20_spill] sm:$0xff] }
  0xae   : > { %6560 = vmatprep.mubr.f32.mxu0 %v679_v22  ;;  %v9830_v22 = vld [vmem:[#allocation23_spill] sm:$0xff] }
  0xaf   : > { %6321 = vmatmul.mubr.f32.gmra.mrb[30].mxu1 %v691_v31 }
  0xb0   : > { %6355 = vmatprep.mubr.f32.mxu1 %v7449_v17 }
  0xb1   : > { %6561 = vmatmul.mubr.f32.gmra.mrb[30].mxu0 %v689_v6  ;;  %v9853_v6 = vld [vmem:[#allocation32_spill] sm:$0xff] }
  0xb2   : > { %6595 = vmatprep.mubr.f32.mxu0 %v7449_v17 }
  0xb3   : > { %6356 = vmatmul.mubr.f32.vlgmr.msra.gmra.mrb[0].mxu1 %v7500_v33 }
  0xb4   : > { %6790 = vmatpush3.bf16.msra.mxu1 %v8036_v36  ;;  %6358 = vmatprep.mubr.f32.mxu1 %v7529_v43  ;;  %v9833_v36 = vld [vmem:[#allocation29_spill] sm:$0xff] }
  0xb5   : > { %6596 = vmatmul.mubr.f32.vlgmr.msra.gmra.mrb[0].mxu0 %v7500_v33  ;;  %6792 = vmatprep.subr.bf16.mxu1 %v7974_v47 }
  0xb6   : > { %6886 = vmatpush3.bf16.msra.mxu0 %v7424_v10  ;;  %6598 = vmatprep.mubr.f32.mxu0 %v7529_v43  ;;  %v9826_v10 = vld [vmem:[#allocation18_spill] sm:$0xff] }
  0xb7   : > { %6888 = vmatprep.subr.bf16.mxu0 %v7432_v13  ;;  %6359 = vmatmul.mubr.f32.gmra.mrb[2].mxu1 %v7532_v45 }
  0xb8   : > { %6361 = vmatprep.mubr.f32.mxu1 %v7558_v53  ;;  %6794 = vmatpush3.bf16.msra.mxu1 %v7974_v47  ;;  %v9828_v47 = vld [vmem:[#allocation10_spill] sm:$0xff] }
  0xb9   : > { %6599 = vmatmul.mubr.f32.gmra.mrb[2].mxu0 %v7532_v45  ;;  %6796 = vmatprep.subr.bf16.mxu1 %v7989_v51 }
  0xba   : > { %6601 = vmatprep.mubr.f32.mxu0 %v7558_v53  ;;  %6890 = vmatpush3.bf16.msra.mxu0 %v7432_v13  ;;  %v9829_v13 = vld [vmem:[#allocation21_spill] sm:$0xff] }
  0xbb   : > { %6892 = vmatprep.subr.bf16.mxu0 %v7457_v18  ;;  %6362 = vmatmul.mubr.f32.gmra.mrb[4].mxu1 %v9826_v10 }
  0xbc   : > { %6364 = vmatprep.mubr.f32.mxu1 %v9827_v21  ;;  %6798 = vmatpush3.bf16.msra.mxu1 %v7989_v51  ;;  %v9831_v51 = vld [vmem:[#allocation11_spill] sm:$0xff] }
  0xbd   : > { %6602 = vmatmul.mubr.f32.gmra.mrb[4].mxu0 %v9826_v10  ;;  %6800 = vmatprep.subr.bf16.mxu1 %v7997_v0 }
  0xbe   : > { %6604 = vmatprep.mubr.f32.mxu0 %v9827_v21  ;;  %6894 = vmatpush3.bf16.msra.mxu0 %v7457_v18  ;;  %v9832_v18 = vld [vmem:[#allocation26_spill] sm:$0xff] }
  0xbf   : > { %6896 = vmatprep.subr.bf16.mxu0 %v9828_v47  ;;  %6365 = vmatmul.mubr.f32.gmra.mrb[6].mxu1 %v9829_v13 }
  0xc0   : > { %6367 = vmatprep.mubr.f32.mxu1 %v9830_v22  ;;  %6802 = vmatpush3.bf16.msra.mxu1 %v7997_v0  ;;  %v9834_v0 = vld [vmem:[#allocation13_spill] sm:$0xff] }
  0xc1   : > { %6605 = vmatmul.mubr.f32.gmra.mrb[6].mxu0 %v9829_v13  ;;  %6804 = vmatprep.subr.bf16.mxu1 %v8001_v11 }
  0xc2   : > { %6607 = vmatprep.mubr.f32.mxu0 %v9830_v22  ;;  %6898 = vmatpush3.bf16.msra.mxu0 %v9828_v47 }
  0xc3   : > { %6900 = vmatprep.subr.bf16.mxu0 %v9831_v51  ;;  %6368 = vmatmul.mubr.f32.gmra.mrb[8].mxu1 %v9832_v18 }
  0xc4   : > { %6370 = vmatprep.mubr.f32.mxu1 %v9833_v36  ;;  %6806 = vmatpush3.bf16.msra.mxu1 %v8001_v11  ;;  %v9835_v11 = vld [vmem:[#allocation16_spill] sm:$0xff] }
  0xc5   : > { %6608 = vmatmul.mubr.f32.gmra.mrb[8].mxu0 %v9832_v18  ;;  %6808 = vmatprep.subr.bf16.mxu1 %v8006_v32 }
  0xc6   : > { %6610 = vmatprep.mubr.f32.mxu0 %v9833_v36  ;;  %6902 = vmatpush3.bf16.msra.mxu0 %v9831_v51 }
  0xc7   : > { %6904 = vmatprep.subr.bf16.mxu0 %v9834_v0  ;;  %6371 = vmatmul.mubr.f32.gmra.mrb[10].mxu1 %v7725_v27 }
  0xc8   : > { %6373 = vmatprep.mubr.f32.mxu1 %v7727_v19  ;;  %6810 = vmatpush3.bf16.msra.mxu1 %v8006_v32  ;;  %v9838_v32 = vld [vmem:[#allocation19_spill] sm:$0xff] }
  0xc9   : > { %6611 = vmatmul.mubr.f32.gmra.mrb[10].mxu0 %v7725_v27  ;;  %6812 = vmatprep.subr.bf16.mxu1 %v8010_v34 }
  0xca   : > { %6613 = vmatprep.mubr.f32.mxu0 %v7727_v19  ;;  %6906 = vmatpush3.bf16.msra.mxu0 %v9834_v0 }
  0xcb   : > { %6908 = vmatprep.subr.bf16.mxu0 %v9835_v11  ;;  %6374 = vmatmul.mubr.f32.gmra.mrb[12].mxu1 %v9836_v40 }
  0xcc   : > { %6376 = vmatprep.mubr.f32.mxu1 %v9837_v58  ;;  %6814 = vmatpush3.bf16.msra.mxu1 %v8010_v34  ;;  %v9839_v34 = vld [vmem:[#allocation36_spill] sm:$0xff] }
  0xcd   : > { %6614 = vmatmul.mubr.f32.gmra.mrb[12].mxu0 %v9836_v40  ;;  %6816 = vmatprep.subr.bf16.mxu1 %v8012_v38 }
  0xce   : > { %6616 = vmatprep.mubr.f32.mxu0 %v9837_v58  ;;  %6910 = vmatpush3.bf16.msra.mxu0 %v9835_v11 }
  0xcf   : > { %6912 = vmatprep.subr.bf16.mxu0 %v9838_v32  ;;  %6377 = vmatmul.mubr.f32.gmra.mrb[14].mxu1 %v7813_v12 }
  0xd0   : > { %6379 = vmatprep.mubr.f32.mxu1 %v7832_v52  ;;  %6818 = vmatpush3.bf16.msra.mxu1 %v8012_v38  ;;  %v9841_v38 = vld [vmem:[#allocation38_spill] sm:$0xff] }
  0xd1   : > { %6617 = vmatmul.mubr.f32.gmra.mrb[14].mxu0 %v7813_v12 }
  0xd2   : > { %6619 = vmatprep.mubr.f32.mxu0 %v7832_v52  ;;  %6914 = vmatpush3.bf16.msra.mxu0 %v9838_v32 }
  0xd3   : > { %6380 = vmatmul.mubr.f32.gmra.mrb[16].mxu1 %v7834_v29 }
  0xd4   : > { %6382 = vmatprep.mubr.f32.mxu1 %v7847_v50 }
  0xd5   : > { %6620 = vmatmul.mubr.f32.gmra.mrb[16].mxu0 %v7834_v29 }
  0xd6   : > { %6622 = vmatprep.mubr.f32.mxu0 %v7847_v50 }
  0xd7   : > { %6383 = vmatmul.mubr.f32.gmra.mrb[18].mxu1 %v7871_v26 }
  0xd8   : > { %6385 = vmatprep.mubr.f32.mxu1 %v9839_v34 }
  0xd9   : > { %6623 = vmatmul.mubr.f32.gmra.mrb[18].mxu0 %v7871_v26 }
  0xda   : > { %6625 = vmatprep.mubr.f32.mxu0 %v9839_v34 }
  0xdb   : > { %6386 = vmatmul.mubr.f32.gmra.mrb[20].mxu1 %v9840_v37 }
  0xdc   : > { %6388 = vmatprep.mubr.f32.mxu1 %v9841_v38 }
  0xdd   : > { %6626 = vmatmul.mubr.f32.gmra.mrb[20].mxu0 %v9840_v37 }
  0xde   : > { %6628 = vmatprep.mubr.f32.mxu0 %v9841_v38 }
  0xdf   : > { %6389 = vmatmul.mubr.f32.gmra.mrb[22].mxu1 %v7946_v56 }
  0xe0   : > { %6391 = vmatprep.mubr.f32.mxu1 %v7956_v54 }
  0xe1   : > { %6629 = vmatmul.mubr.f32.gmra.mrb[22].mxu0 %v7946_v56 }
  0xe2   : > { %6631 = vmatprep.mubr.f32.mxu0 %v7956_v54 }
  0xe3   : > { %6392 = vmatmul.mubr.f32.gmra.mrb[24].mxu1 %v7970_v24 }
  0xe4   : > { %6394 = vmatprep.mubr.f32.mxu1 %v7984_v7 }
  0xe5   : > { %6632 = vmatmul.mubr.f32.gmra.mrb[24].mxu0 %v7970_v24 }
  0xe6   : > { %6634 = vmatprep.mubr.f32.mxu0 %v7984_v7 }
  0xe7   : > { %6395 = vmatmul.mubr.f32.gmra.mrb[26].mxu1 %v8022_v3 }
  0xe8   : > { %6397 = vmatprep.mubr.f32.mxu1 %v8030_v44 }
  0xe9   : > { %6635 = vmatmul.mubr.f32.gmra.mrb[26].mxu0 %v8022_v3 }
  0xea   : > { %6637 = vmatprep.mubr.f32.mxu0 %v8030_v44 }
  0xeb   : > { %6398 = vmatmul.mubr.f32.gmra.mrb[28].mxu1 %v8046_v35 }
  0xec   : > { %6400 = vmatprep.mubr.f32.mxu1 %v8055_v49 }
  0xed   : > { %6638 = vmatmul.mubr.f32.gmra.mrb[28].mxu0 %v8046_v35 }
  0xee   : > { %6640 = vmatprep.mubr.f32.mxu0 %v8055_v49 }
  0xef   : > { %6401 = vmatmul.mubr.f32.gmra.mrb[30].mxu1 %v8066_v23 }
  0xf0   : > { %6435 = vmatprep.mubr.f32.mxu1 %v9842_v16 }
  0xf1   : > { %6641 = vmatmul.mubr.f32.gmra.mrb[30].mxu0 %v8066_v23 }
  0xf2   : > { %6675 = vmatprep.mubr.f32.mxu0 %v7449_v17  ;;  %v9848_v17 = vld [vmem:[#allocation24_spill] sm:$0xff] }
  0xf3   : > { %6436 = vmatmul.mubr.f32.vlgmr.msra.gmra.mrb[0].mxu1 %v9843_v60 }
  0xf4   : > { %6438 = vmatprep.mubr.f32.mxu1 %v9844_v42 }
  0xf5   : > { %6676 = vmatmul.mubr.f32.vlgmr.msra.gmra.mrb[0].mxu0 %v7500_v33  ;;  %v9849_v33 = vld [vmem:[#allocation25_spill] sm:$0xff] }
  0xf6   : > { %6678 = vmatprep.mubr.f32.mxu0 %v7529_v43  ;;  %v9850_v43 = vld [vmem:[#allocation27_spill] sm:$0xff] }
  0xf7   : > { %6439 = vmatmul.mubr.f32.gmra.mrb[2].mxu1 %v9845_v46 }
  0xf8   : > { %6441 = vmatprep.mubr.f32.mxu1 %v9846_v1 }
  0xf9   : > { %6679 = vmatmul.mubr.f32.gmra.mrb[2].mxu0 %v7532_v45  ;;  %v9851_v45 = vld [vmem:[#allocation28_spill] sm:$0xff] }
  0xfa   : > { %6681 = vmatprep.mubr.f32.mxu0 %v7558_v53  ;;  %v9852_v53 = vld [vmem:[#allocation30_spill] sm:$0xff] }
  0xfb   : > { %6442 = vmatmul.mubr.f32.gmra.mrb[4].mxu1 %v9847_v15 }
  0xfc   : > { %6444 = vmatprep.mubr.f32.mxu1 %v9848_v17 }
  0xfd   : > { %6682 = vmatmul.mubr.f32.gmra.mrb[4].mxu0 %v9826_v10 }
  0xfe   : > { %6684 = vmatprep.mubr.f32.mxu0 %v9827_v21 }
  0xff   : > { %6445 = vmatmul.mubr.f32.gmra.mrb[6].mxu1 %v9849_v33 }
 0x100   : > { %6447 = vmatprep.mubr.f32.mxu1 %v9850_v43 }
 0x101   : > { %6685 = vmatmul.mubr.f32.gmra.mrb[6].mxu0 %v9829_v13 }
 0x102   : > { %6687 = vmatprep.mubr.f32.mxu0 %v9830_v22 }
 0x103   : > { %6448 = vmatmul.mubr.f32.gmra.mrb[8].mxu1 %v9851_v45 }
 0x104   : > { %6450 = vmatprep.mubr.f32.mxu1 %v9852_v53 }
 0x105   : > { %6688 = vmatmul.mubr.f32.gmra.mrb[8].mxu0 %v9832_v18 }
 0x106   : > { %6690 = vmatprep.mubr.f32.mxu0 %v9833_v36 }
 0x107   : > { %6451 = vmatmul.mubr.f32.gmra.mrb[10].mxu1 %v9853_v6 }
 0x108   : > { %6453 = vmatprep.mubr.f32.mxu1 %v9854_v4 }
 0x109   : > { %6691 = vmatmul.mubr.f32.gmra.mrb[10].mxu0 %v7725_v27  ;;  %v9856_v27 = vld [vmem:[#allocation39_spill] sm:$0xff] }
 0x10a   : > { %6693 = vmatprep.mubr.f32.mxu0 %v7727_v19  ;;  %v9858_v19 = vld [vmem:[#allocation41_spill] sm:$0xff] }
 0x10b   : > { %6454 = vmatmul.mubr.f32.gmra.mrb[12].mxu1 %v9855_v2 }
 0x10c   : > { %6456 = vmatprep.mubr.f32.mxu1 %v7811_v14  ;;  %v9718_v14 = vlaneseq }
 0x10d   : > { %6694 = vmatmul.mubr.f32.gmra.mrb[12].mxu0 %v9836_v40 }
 0x10e   : > { %6696 = vmatprep.mubr.f32.mxu0 %v9837_v58 }
 0x10f   : > { %6457 = vmatmul.mubr.f32.gmra.mrb[14].mxu1 %v7854_v8  ;;  %v9857_v8 = vld [vmem:[#allocation40_spill] sm:$0xff] }
 0x110   : > { %6459 = vmatprep.mubr.f32.mxu1 %v7866_v25 }
 0x111   : > { %6697 = vmatmul.mubr.f32.gmra.mrb[14].mxu0 %v7813_v12  ;;  %v9859_v12 = vld [vmem:[#allocation42_spill] sm:$0xff] }
 0x112   : > { %6699 = vmatprep.mubr.f32.mxu0 %v7832_v52  ;;  %v7256_v52 = vmov 1966171168  }
 0x113   : > { %6460 = vmatmul.mubr.f32.gmra.mrb[16].mxu1 %v7869_v62 }
 0x114   : > { %6462 = vmatprep.mubr.f32.mxu1 %v7880_v59  ;;  %v8245_v59 = vshrl.u32 %v9718_v14, 7 }
 0x115   : > { %6700 = vmatmul.mubr.f32.gmra.mrb[16].mxu0 %v7834_v29  ;;  %v2305_v29 = vunpack.c.l.s4 %v7256_v52 }
 0x116   : > { %6702 = vmatprep.mubr.f32.mxu0 %v7847_v50  ;;  %9860 = vst [vmem:[#allocation18_spill] sm:$0xff] %v8245_v59 }
 0x117   : > { %6463 = vmatmul.mubr.f32.gmra.mrb[18].mxu1 %v7905_v30 }
 0x118   : > { %6465 = vmatprep.mubr.f32.mxu1 %v7927_v63 }
 0x119   : > { %6703 = vmatmul.mubr.f32.gmra.mrb[18].mxu0 %v7871_v26  ;;  %v2306_v26 = vunpack.c.0.s8 %v2305_v29 }
 0x11a   : > { %6705 = vmatprep.mubr.f32.mxu0 %v9839_v34 }
 0x11b   : > { %6466 = vmatmul.mubr.f32.gmra.mrb[20].mxu1 %v7937_v9 }
 0x11c   : > { %6468 = vmatprep.mubr.f32.mxu1 %v7951_v5 }
 0x11d   : > { %6706 = vmatmul.mubr.f32.gmra.mrb[20].mxu0 %v9840_v37 }
 0x11e   : > { %6708 = vmatprep.mubr.f32.mxu0 %v9841_v38 }
 0x11f   : > { %6469 = vmatmul.mubr.f32.gmra.mrb[22].mxu1 %v9856_v27 }
 0x120   : > { %6471 = vmatprep.mubr.f32.mxu1 %v9857_v8 }
 0x121   : > { %6709 = vmatmul.mubr.f32.gmra.mrb[22].mxu0 %v7946_v56 }
 0x122   : > { %6711 = vmatprep.mubr.f32.mxu0 %v7956_v54  ;;  %v8248_v54 = vsub.s32 %v2306_v26, %v8245_v59 }
 0x123   : > { %6472 = vmatmul.mubr.f32.gmra.mrb[24].mxu1 %v9858_v19 }
 0x124   : > { %6474 = vmatprep.mubr.f32.mxu1 %v9859_v12 }
 0x125   : > { %6712 = vmatmul.mubr.f32.gmra.mrb[24].mxu0 %v7970_v24  ;;  %v7255_v24 = vmov 0  }
 0x126   : > { %6714 = vmatprep.mubr.f32.mxu0 %v7984_v7  ;;  %7136 = vset.pattern.permute.xlu0 %v7255_v24 }
 0x127   : > { %6475 = vmatmul.mubr.f32.gmra.mrb[26].mxu1 %v8044_v57  ;;  %7137 = vset.pattern.permute.xlu1 %v7255_v24 }
 0x128   : > { %6477 = vmatprep.mubr.f32.mxu1 %v8053_v55 }
 0x129   : > { %6715 = vmatmul.mubr.f32.gmra.mrb[26].mxu0 %v8022_v3 }
 0x12a   : > { %6717 = vmatprep.mubr.f32.mxu0 %v8030_v44 }
 0x12b   : > { %6478 = vmatmul.mubr.f32.gmra.mrb[28].mxu1 %v8064_v39 }
 0x12c   : > { %6480 = vmatprep.mubr.f32.mxu1 %v8073_v28 }
 0x12d   : > { %6718 = vmatmul.mubr.f32.gmra.mrb[28].mxu0 %v8046_v35 }
 0x12e   : > { %6720 = vmatprep.mubr.f32.mxu0 %v8055_v49 }
 0x12f   : > { %6481 = vmatmul.mubr.f32.gmra.mrb[30].mxu1 %v8078_v41 }
 0x131   : > { %6721 = vmatmul.mubr.f32.gmra.mrb[30].mxu0 %v8066_v23 }
 0x1c6   : > { %v6437_v50 = vpop.f32.mrb[0].mxu1 }
 0x1c7   : > { %v1134_v30 = vpop.f32.mrb[1].mxu1 }
 0x1c8   : > { %v6677_v25 = vpop.f32.mrb[0].mxu0 }
 0x1c9   : > { %v6915_v62 = vadd.f32 %v6677_v25, %v6437_v50  ;;  %v2080_v63 = vpop.f32.mrb[1].mxu0 }
 0x1ca   : > { %v6916_v9 = vadd.f32 %v2080_v63, %v1134_v30  ;;  %v6440_v56 = vpop.f32.mrb[2].mxu1 }
 0x1cb   : > { %v1148_v7 = vpop.f32.mrb[3].mxu1  ;;  %v2352_v57 = vcombine.high %v6915_v62, %v6915_v62  ;;  %v2359_v49 = vrot.slane %v6915_v62, %v8248_v54 }
 0x1cc   : > { %v6680_v5 = vpop.f32.mrb[2].mxu0  ;;  %v2303_v41 = vcombine.high %v6916_v9, %v6916_v9  ;;  %v2310_v48 = vrot.slane %v6916_v9, %v8248_v54 }
 0x1cd   : > { %v6917_v23 = vadd.f32 %v6680_v5, %v6440_v56  ;;  %v2092_v3 = vpop.f32.mrb[3].mxu0  ;;  %v2366_v61 = vrot.slane %v2352_v57, %v8248_v54  ;;  %v2367_v10 = vcombine.high %v2359_v49, %v2359_v49  ;;  %v8262_v42 = vrot.slane %v2359_v49, %v8248_v54 }
 0x1ce   : > { %v6918_v44 = vadd.f32 %v2092_v3, %v1148_v7  ;;  %v6443_v35 = vpop.f32.mrb[4].mxu1  ;;  %v2317_v13 = vrot.slane %v2303_v41, %v8248_v54  ;;  %v2318_v36 = vcombine.high %v2310_v48, %v2310_v48  ;;  %v2326_v43 = vrot.slane %v2310_v48, %v8248_v54 }
 0x1cf   : > { %v1162_v39 = vpop.f32.mrb[5].mxu1  ;;  %v2368_v0 = vcombine.high %v2366_v61, %v2366_v61  ;;  %v2450_v11 = vcombine.high %v6917_v23, %v6917_v23  ;;  %v2457_v32 = vrot.slane %v6917_v23, %v8248_v54  ;;  %v8258_v38 = vrot.slane %v2367_v10, %v8248_v54 }
 0x1d0   : > { %v6683_v55 = vpop.f32.mrb[4].mxu0  ;;  %v2319_v16 = vcombine.high %v2317_v13, %v2317_v13  ;;  %v2340_v60 = vrot.slane %v2318_v36, %v8248_v54  ;;  %v8269_v33 = vrot.slane %v2366_v61, %v8248_v54  ;;  %v2401_v53 = vcombine.high %v6918_v44, %v6918_v44 }
 0x1d1   : > { %v2104_v28 = vpop.f32.mrb[5].mxu0  ;;  %v6919_v22 = vadd.f32 %v6683_v55, %v6443_v35  ;;  %v8265_v46 = vrot.slane %v2368_v0, %v8248_v54  ;;  %v2464_v1 = vrot.slane %v2450_v11, %v8248_v54  ;;  %v2465_v45 = vcombine.high %v2457_v32, %v2457_v32 }
 0x1d2   : > { %v6446_v20 = vpop.f32.mrb[6].mxu1  ;;  %v6920_v51 = vadd.f32 %v2104_v28, %v1162_v39  ;;  %v3920_v2 = vcombine.low %v8262_v42, %v8258_v38  ;;  %v8279_v27 = vrot.slane %v2317_v13, %v8248_v54  ;;  %v8282_v8 = vrot.slane %v2319_v16, %v8248_v54 }
 0x1d3   : > { %v1176_v21 = vpop.f32.mrb[7].mxu1  ;;  %v2548_v19 = vcombine.high %v6919_v22, %v6919_v22  ;;  %v3871_v24 = vcombine.low %v2326_v43, %v2340_v60  ;;  %v2408_v52 = vrot.slane %v6918_v44, %v8248_v54  ;;  %v2555_v29 = vrot.slane %v6919_v22, %v8248_v54 }
 0x1d4   : > { %v6686_v31 = vpop.f32.mrb[6].mxu0  ;;  %v5884_v25 = vcombine.high %v2326_v43, %v2340_v60  ;;  %v2466_v62 = vcombine.high %v2464_v1, %v2464_v1  ;;  %v2499_v26 = vcombine.high %v6920_v51, %v6920_v51  ;;  %v2473_v56 = vrot.slane %v2457_v32, %v8248_v54 }
 0x1d5   : > { %v2116_v47 = vpop.f32.mrb[7].mxu0  ;;  %v8254_v18 = vadd.f32 %v6686_v31, %v6446_v20  ;;  %v2487_v5 = vrot.slane %v2465_v45, %v8248_v54  ;;  %v2415_v23 = vrot.slane %v2401_v53, %v8248_v54  ;;  %v2562_v35 = vrot.slane %v2548_v19, %v8248_v54 }
 0x1d6   : > { %v6449_v40 = vpop.f32.mrb[8].mxu1  ;;  %v2506_v55 = vrot.slane %v6920_v51, %v8248_v54  ;;  %v2416_v49 = vcombine.high %v2408_v52, %v2408_v52  ;;  %v2563_v39 = vcombine.high %v2555_v29, %v2555_v29  ;;  %v8309_v28 = vadd.f32 %v2116_v47, %v1176_v21 }
 0x1d7   : > { %v1190_v34 = vpop.f32.mrb[9].mxu1  ;;  %v8314_v48 = vrot.slane %v3871_v24, %v8248_v54  ;;  %v8317_v61 = vrot.slane %v2464_v1, %v8248_v54  ;;  %v8320_v20 = vrot.slane %v2466_v62, %v8248_v54  ;;  %v2513_v31 = vrot.slane %v2499_v26, %v8248_v54 }
 0x1d8   : > { %v6689_v58 = vpop.f32.mrb[8].mxu0  ;;  %v4018_v22 = vcombine.low %v2473_v56, %v2487_v5  ;;  %v5890_v21 = vcombine.high %v2473_v56, %v2487_v5  ;;  %v2417_v47 = vcombine.high %v2415_v23, %v2415_v23  ;;  %v2646_v51 = vcombine.high %v8254_v18, %v8254_v18 }
 0x1d9   : > { %v2128_v37 = vpop.f32.mrb[9].mxu0  ;;  %v8311_v41 = vadd.f32 %v6689_v58, %v6449_v40  ;;  %v2564_v11 = vcombine.high %v2562_v35, %v2562_v35  ;;  %v2514_v40 = vcombine.high %v2506_v55, %v2506_v55  ;;  %v8338_v16 = vrot.slane %v5884_v25, %v8248_v54 }
 0x1da   : > { %v6452_v15 = vpop.f32.mrb[10].mxu1  ;;  %v8333_v58 = vadd.f32 %v2128_v37, %v1190_v34  ;;  %v8341_v60 = vrot.slane %v2416_v49, %v8248_v54  ;;  %v2585_v1 = vrot.slane %v2563_v39, %v8248_v54  ;;  %v2653_v43 = vrot.slane %v8254_v18, %v8248_v54 }
 0x1db   : > { %v8274_v4 = vpop.f32.mrb[11].mxu1  ;;  %v8351_v37 = vrot.slane %v2408_v52, %v8248_v54  ;;  %v8358_v19 = vrot.slane %v4018_v22, %v8248_v54  ;;  %v8361_v24 = vrot.slane %v2417_v47, %v8248_v54  ;;  %v2571_v18 = vrot.slane %v2555_v29, %v8248_v54 }
 0x1dc   : > { %v6692_v17 = vpop.f32.mrb[10].mxu0  ;;  %v2660_v25 = vrot.slane %v2646_v51, %v8248_v54  ;;  %v8370_v52 = vrot.slane %v5890_v21, %v8248_v54  ;;  %v8373_v56 = vrot.slane %v2415_v23, %v8248_v54  ;;  %v8376_v5 = vrot.slane %v2564_v11, %v8248_v54 }
 0x1dd   : > { %v8272_v6 = vpop.f32.mrb[11].mxu0  ;;  %v8335_v32 = vadd.f32 %v6692_v17, %v6452_v15  ;;  %v2515_v15 = vcombine.high %v2513_v31, %v2513_v31  ;;  %v2536_v49 = vrot.slane %v2514_v40, %v8248_v54  ;;  %v4116_v22 = vcombine.low %v2571_v18, %v2585_v1 }
 0x1de   : > { %v8290_v30 = vpop.f32.mrb[12].mxu1  ;;  %v2661_v47 = vcombine.high %v2653_v43, %v2653_v43  ;;  %v8384_v51 = vrot.slane %v2562_v35, %v8248_v54  ;;  %v5894_v21 = vcombine.high %v2571_v18, %v2585_v1  ;;  %v2522_v23 = vrot.slane %v2506_v55, %v8248_v54 }
 0x1df   : > { %v8301_v3 = vpop.f32.mrb[13].mxu1  ;;  %v8388_v14 = vrot.slane %v2515_v15, %v8248_v54  ;;  %v8399_v39 = vrot.slane %v2513_v31, %v8248_v54  ;;  %v2662_v35 = vcombine.high %v2660_v25, %v2660_v25  ;;  %v2597_v34 = vcombine.high %v8309_v28, %v8309_v28 }
 0x1e0   : > { %v8292_v63 = vpop.f32.mrb[12].mxu0  ;;  %v4067_v29 = vcombine.low %v2522_v23, %v2536_v49  ;;  %v8412_v45 = vrot.slane %v4116_v22, %v8248_v54  ;;  %v5892_v31 = vcombine.high %v2522_v23, %v2536_v49  ;;  %v8415_v57 = vrot.slane %v2661_v47, %v8248_v54 }
 0x1e1   : > { %v8299_v7 = vpop.f32.mrb[13].mxu0  ;;  %v2604_v44 = vrot.slane %v8309_v28, %v8248_v54  ;;  %v8420_v9 = vrot.slane %v5894_v21, %v8248_v54  ;;  %v2744_v15 = vcombine.high %v8311_v41, %v8311_v41  ;;  %v2751_v22 = vrot.slane %v8311_v41, %v8248_v54 }
 0x1e2   : > { %v8323_v10 = vpop.f32.mrb[14].mxu1  ;;  %v2669_v28 = vrot.slane %v2653_v43, %v8248_v54  ;;  %v8436_v21 = vrot.slane %v2662_v35, %v8248_v54  ;;  %v3930_v23 = vrot.slane %v3920_v2, %v8248_v54  ;;  %v8447_v12 = vrot.slane %v4067_v29, %v8248_v54 }
 0x1e3   : > { %v8331_v0 = vpop.f32.mrb[15].mxu1  ;;  %v2611_v59 = vrot.slane %v2597_v34, %v8248_v54  ;;  %v9868_v43 = vcombine.high %v8262_v42, %v8258_v38  ;;  %v9869_v47 = vcombine.low %v8269_v33, %v8265_v46  ;;  %v8459_v2 = vrot.slane %v5892_v31, %v8248_v54 }
 0x1e4   : > { %v8325_v13 = vpop.f32.mrb[14].mxu0  ;;  %9867 = vst [vmem:[#allocation29_spill] sm:$0xff] %v8447_v12  ;;  %v4214_v29 = vcombine.low %v2669_v28, %v8415_v57  ;;  %v2620_v34 = vrot.slane %v2604_v44, %v8248_v54  ;;  %v2759_v38 = vcombine.high %v2751_v22, %v2751_v22  ;;  %v9870_v42 = vcombine.high %v8269_v33, %v8265_v46 }
 0x1e5   : > { %v8329_v36 = vpop.f32.mrb[15].mxu0  ;;  %v3937_v35 = vrot.slane %v9868_v43, %v8248_v54  ;;  %v2613_v33 = vcombine.high %v2611_v59, %v2611_v59  ;;  %v2767_v46 = vrot.slane %v2751_v22, %v8248_v54 }
 0x1e6   : > { %v8353_v17 = vpop.f32.mrb[16].mxu1  ;;  %v3951_v43 = vrot.slane %v9870_v42, %v8248_v54  ;;  %v8487_v42 = vrot.slane %v2611_v59, %v8248_v54  ;;  %v2781_v59 = vrot.slane %v2759_v38, %v8248_v54 }
 0x1e7   : > { %v8367_v26 = vpop.f32.mrb[17].mxu1 }
 0x1e8   : > { %v8355_v53 = vpop.f32.mrb[16].mxu0 }
 0x1e9   : > { %v8365_v62 = vpop.f32.mrb[17].mxu0 }
 0x1ea   : > { %v8390_v11 = vpop.f32.mrb[18].mxu1 }
 0x1eb   : > { %v8403_v55 = vpop.f32.mrb[19].mxu1 }
 0x1ec   : > { %v8392_v40 = vpop.f32.mrb[18].mxu0  ;;  %9862 = vst [vmem:[#allocation10_spill] sm:$0xff] %v8403_v55  ;;  %v3952_v55 = vcombine.low %v3930_v23, %v3937_v35  ;;  %v8495_v23 = vadd.f32 %v8272_v6, %v8274_v4  ;;  %v8499_v35 = vadd.f32 %v8292_v63, %v8290_v30  ;;  %v2702_v6 = vrot.slane %v8333_v58, %v8248_v54 }
 0x1ed   : > { %v8401_v1 = vpop.f32.mrb[19].mxu0 }
 0x1ee   : > { %9861 = vst [vmem:[#allocation20_spill] sm:$0xff] %v8401_v1  ;;  %v8428_v50 = vpop.f32.mrb[20].mxu1  ;;  %v3960_v30 = vrot.slane %v3952_v55, %v8248_v54  ;;  %v8530_v55 = vadd.f32 %v8299_v7, %v8301_v3 }
 0x1ef   : > { %9863 = vst [vmem:[#allocation21_spill] sm:$0xff] %v8428_v50  ;;  %v8444_v41 = vpop.f32.mrb[21].mxu1  ;;  %v2758_v50 = vrot.slane %v2744_v15, %v8248_v54 }
 0x1f0   : > { %v8430_v49 = vpop.f32.mrb[20].mxu0  ;;  %9866 = vst [vmem:[#allocation26_spill] sm:$0xff] %v8444_v41  ;;  %v2612_v41 = vcombine.high %v2604_v44, %v2604_v44  ;;  %v2695_v44 = vcombine.high %v8333_v58, %v8333_v58  ;;  %v3903_v58 = vcombine.low %v8314_v48, %v8338_v16 }
 0x1f1   : > { %9864 = vst [vmem:[#allocation23_spill] sm:$0xff] %v8430_v49  ;;  %v8442_v18 = vpop.f32.mrb[21].mxu0  ;;  %v3944_v49 = vrot.slane %v9869_v47, %v8248_v54  ;;  %v2760_v1 = vcombine.high %v2758_v50, %v2758_v50  ;;  %v8548_v3 = vrot.slane %v2758_v50, %v8248_v54 }
 0x1f2   : > { %9865 = vst [vmem:[#allocation11_spill] sm:$0xff] %v8442_v18  ;;  %v8462_v18 = vrot.slane %v2660_v25, %v8248_v54  ;;  %v8471_v47 = vpop.f32.mrb[22].mxu1  ;;  %v5898_v25 = vcombine.high %v2669_v28, %v8415_v57  ;;  %v8490_v57 = vrot.slane %v4214_v29, %v8248_v54  ;;  %v2634_v28 = vrot.slane %v2612_v41, %v8248_v54 }
 0x1f3   : > { %v8482_v12 = vpop.f32.mrb[23].mxu1  ;;  %v2709_v4 = vrot.slane %v2695_v44, %v8248_v54 }
 0x1f4   : > { %v8473_v31 = vpop.f32.mrb[22].mxu0  ;;  %9873 = vst [vmem:[#allocation31_spill] sm:$0xff] %v8482_v12  ;;  %v4165_v44 = vcombine.low %v2620_v34, %v2634_v28  ;;  %v2710_v12 = vcombine.high %v2702_v6, %v2702_v6 }
 0x1f5   : > { %9871 = vst [vmem:[#allocation13_spill] sm:$0xff] %v8473_v31  ;;  %v8480_v15 = vpop.f32.mrb[23].mxu0  ;;  %v3953_v31 = vcombine.low %v3944_v49, %v3951_v43  ;;  %v9874_v49 = vcombine.low %v8279_v27, %v8282_v8 }
 0x1f6   : > { %9872 = vst [vmem:[#allocation16_spill] sm:$0xff] %v8480_v15  ;;  %v8507_v43 = vpop.f32.mrb[24].mxu1  ;;  %v8538_v15 = vrot.slane %v5898_v25, %v8248_v54 }
 0x1f7   : > { %v3895_v29 = vrot.slane %v9874_v49, %v8248_v54  ;;  %9875 = vst [vmem:[#allocation34_spill] sm:$0xff] %v8507_v43  ;;  %v3967_v63 = vrot.slane %v3953_v31, %v8248_v54  ;;  %v8518_v38 = vpop.f32.mrb[25].mxu1  ;;  %v2842_v49 = vcombine.high %v8335_v32, %v8335_v32  ;;  %v8533_v31 = vrot.slane %v2613_v33, %v8248_v54 }
 0x1f8   : > { %v8509_v41 = vpop.f32.mrb[24].mxu0  ;;  %9878 = vst [vmem:[#allocation37_spill] sm:$0xff] %v8518_v38  ;;  %v4312_v33 = vcombine.low %v2767_v46, %v2781_v59 }
 0x1f9   : > { %9876 = vst [vmem:[#allocation19_spill] sm:$0xff] %v8509_v41  ;;  %v8516_v22 = vpop.f32.mrb[25].mxu0  ;;  %v9879_v41 = vcombine.high %v8279_v27, %v8282_v8  ;;  %v3968_v38 = vcombine.low %v3960_v30, %v3967_v63  ;;  %v5896_v27 = vcombine.high %v2620_v34, %v2634_v28  ;;  %v8541_v8 = vrot.slane %v2760_v1, %v8248_v54 }
 0x1fa   : > { %9877 = vst [vmem:[#allocation36_spill] sm:$0xff] %v8516_v22  ;;  %v2849_v22 = vrot.slane %v8335_v32, %v8248_v54  ;;  %v8543_v16 = vpop.f32.mrb[26].mxu1  ;;  %v2711_v34 = vcombine.high %v2709_v4, %v2709_v4  ;;  %v2856_v1 = vrot.slane %v2842_v49, %v8248_v54  ;;  %v3911_v28 = vrot.slane %v3903_v58, %v8248_v54 }
 0x1fb   : > { %v3902_v43 = vrot.slane %v9879_v41, %v8248_v54  ;;  %v5902_v41 = vcombine.high %v2767_v46, %v2781_v59  ;;  %5443 = vperm.xlu0 %7136, %v3968_v38   ;;  %v8552_v25 = vpop.f32.mrb[27].mxu1  ;;  %v8562_v46 = vrot.slane %v4165_v44, %v8248_v54  ;;  %v8565_v30 = vrot.slane %v5896_v27, %v8248_v54 }
 0x1fc   : > { %v8545_v7 = vpop.f32.mrb[26].mxu0  ;;  %9881 = vst [vmem:[#allocation9_spill] sm:$0xff] %v8552_v25  ;;  %v2857_v59 = vcombine.high %v2849_v22, %v2849_v22  ;;  %v8576_v50 = vrot.slane %v4312_v33, %v8248_v54  ;;  %v2718_v27 = vrot.slane %v2702_v6, %v8248_v54  ;;  %v2858_v38 = vcombine.high %v2856_v1, %v2856_v1 }
 0x1fd   : > { %v3904_v48 = vcombine.low %v3895_v29, %v3902_v43  ;;  %v8550_v32 = vpop.f32.mrb[27].mxu0  ;;  %v8579_v44 = vrot.slane %v5902_v41, %v8248_v54  ;;  %v2732_v43 = vrot.slane %v2710_v12, %v8248_v54  ;;  %v2865_v33 = vrot.slane %v2849_v22, %v8248_v54 }
 0x1fe   : > { %9880 = vst [vmem:[#allocation38_spill] sm:$0xff] %v8550_v32  ;;  %v8571_v58 = vpop.f32.mrb[28].mxu1  ;;  %v2879_v41 = vrot.slane %v2857_v59, %v8248_v54  ;;  %v2793_v6 = vcombine.high %v8495_v23, %v8495_v23  ;;  %v9886_v12 = vcombine.low %v8351_v37, %v8341_v60  ;;  %v9888_v22 = vcombine.low %v8373_v56, %v8361_v24 }
 0x1ff   : > { %v3918_v29 = vrot.slane %v3904_v48, %v8248_v54  ;;  %9882 = vst [vmem:[#allocation12_spill] sm:$0xff] %v8571_v58  ;;  %v8585_v63 = vpop.f32.mrb[29].mxu1 }
 0x200   : > { %v8573_v48 = vpop.f32.mrb[28].mxu0  ;;  %9885 = vst [vmem:[#allocation17_spill] sm:$0xff] %v8585_v63  ;;  %v2800_v63 = vrot.slane %v8495_v23, %v8248_v54  ;;  %v3993_v59 = vrot.slane %v9888_v22, %v8248_v54  ;;  %v5900_v23 = vcombine.high %v2718_v27, %v2732_v43  ;;  %v2940_v22 = vcombine.high %v8499_v35, %v8499_v35 }
 0x201   : > { %v3919_v49 = vcombine.low %v3911_v28, %v3918_v29  ;;  %9883 = vst [vmem:[#allocation14_spill] sm:$0xff] %v8573_v48  ;;  %v8583_v32 = vpop.f32.mrb[29].mxu0  ;;  %v8588_v28 = vrot.slane %v2709_v4, %v8248_v54  ;;  %v8591_v29 = vrot.slane %v2711_v34, %v8248_v54  ;;  %v9887_v4 = vcombine.high %v8351_v37, %v8341_v60 }
 0x202   : > { %9884 = vst [vmem:[#allocation15_spill] sm:$0xff] %v8583_v32  ;;  %v3979_v32 = vrot.slane %v9886_v12, %v8248_v54  ;;  %v8617_v12 = vadd.f32 %v8325_v13, %v8323_v10  ;;  %v8619_v58 = vpop.f32.mrb[30].mxu1  ;;  %v4263_v37 = vcombine.low %v2718_v27, %v2732_v43  ;;  %v8635_v13 = vrot.slane %v2858_v38, %v8248_v54 }
 0x203   : > { %5440 = vperm.xlu0 %7136, %v3919_v49   ;;  %v3986_v34 = vrot.slane %v9887_v4, %v8248_v54  ;;  %v9889_v49 = vcombine.high %v8373_v56, %v8361_v24  ;;  %9890 = vst [vmem:[#allocation22_spill] sm:$0xff] %v8619_v58  ;;  %v8624_v4 = vrot.slane %v2856_v1, %v8248_v54  ;;  %v8630_v24 = vpop.f32.mrb[31].mxu1 }
 0x204   : > { %v8621_v60 = vpop.f32.mrb[30].mxu0  ;;  %9893 = vst [vmem:[#allocation27_spill] sm:$0xff] %v8630_v24  ;;  %v2807_v43 = vrot.slane %v2793_v6, %v8248_v54  ;;  %v2947_v1 = vrot.slane %v8499_v35, %v8248_v54  ;;  %v9894_v27 = vcombine.low %v8317_v61, %v8320_v20  ;;  %v9895_v24 = vcombine.high %v8317_v61, %v8320_v20 }
 0x205   : > { %v4000_v48 = vrot.slane %v9889_v49, %v8248_v54  ;;  %9891 = vst [vmem:[#allocation24_spill] sm:$0xff] %v8621_v60  ;;  %v8628_v25 = vpop.f32.mrb[31].mxu0  ;;  %v4001_v56 = vcombine.low %v3979_v32, %v3986_v34  ;;  %v4410_v60 = vcombine.low %v2865_v33, %v2879_v41  ;;  %v2808_v38 = vcombine.high %v2800_v63, %v2800_v63 }
 0x206   : > { %9892 = vst [vmem:[#allocation25_spill] sm:$0xff] %v8628_v25  ;;  %v4042_v25 = vrot.slane %v9894_v27, %v8248_v54  ;;  %v4049_v10 = vrot.slane %v9895_v24, %v8248_v54  ;;  %v8653_v35 = vrot.slane %v4263_v37, %v8248_v54  ;;  %v2954_v34 = vrot.slane %v2940_v22, %v8248_v54 }
 0x207   : > { %v4002_v49 = vcombine.low %v3993_v59, %v4000_v48  ;;  %v4009_v32 = vrot.slane %v4001_v56, %v8248_v54  ;;  %v4050_v59 = vcombine.low %v8358_v19, %v8370_v52  ;;  %v8659_v61 = vrot.slane %v5900_v23, %v8248_v54 }
 0x208   : > { %v5906_v20 = vcombine.high %v2865_v33, %v2879_v41  ;;  %v2809_v27 = vcombine.high %v2807_v43, %v2807_v43  ;;  %v2955_v6 = vcombine.high %v2947_v1, %v2947_v1  ;;  %v4051_v37 = vcombine.low %v4042_v25, %v4049_v10 }
 0x209   : > { %v4016_v48 = vrot.slane %v4002_v49, %v8248_v54  ;;  %v8666_v58 = vrot.slane %v4410_v60, %v8248_v54  ;;  %v2830_v22 = vrot.slane %v2808_v38, %v8248_v54  ;;  %v6930_v19 = vadd.f32 %v8329_v36, %v8331_v0 }
 0x20a   : > { %v8673_v52 = vadd.f32 %v8355_v53, %v8353_v17  ;;  %v2956_v33 = vcombine.high %v2954_v34, %v2954_v34  ;;  %v2891_v41 = vcombine.high %v8530_v55, %v8530_v55  ;;  %v4058_v23 = vrot.slane %v4050_v59, %v8248_v54 }
 0x20b   : > { %v4017_v56 = vcombine.low %v4009_v32, %v4016_v48  ;;  %v4065_v25 = vrot.slane %v4051_v37, %v8248_v54  ;;  %v8680_v60 = vrot.slane %v5906_v20, %v8248_v54  ;;  %v2816_v10 = vrot.slane %v2800_v63, %v8248_v54 }
 0x20c   : > { %v2963_v38 = vrot.slane %v2947_v1, %v8248_v54  ;;  %v2898_v36 = vrot.slane %v8530_v55, %v8248_v54  ;;  %v8687_v0 = vrot.slane %v2809_v27, %v8248_v54  ;;  %v2977_v17 = vrot.slane %v2955_v6, %v8248_v54 }
 0x20d   : > { %5446 = vperm.xlu1 %7137, %v4017_v56   ;;  %v4066_v53 = vcombine.low %v4058_v23, %v4065_v25  ;;  %v9896_v32 = vcombine.low %v8384_v51, %v8376_v5  ;;  %v8695_v59 = vrot.slane %v2807_v43, %v8248_v54  ;;  %v4361_v63 = vcombine.low %v2816_v10, %v2830_v22 }
 0x20e   : > { %v5904_v20 = vcombine.high %v2816_v10, %v2830_v22  ;;  %v3038_v1 = vcombine.high %v8617_v12, %v8617_v12  ;;  %v8700_v55 = vrot.slane %v2956_v33, %v8248_v54  ;;  %v2905_v56 = vrot.slane %v2891_v41, %v8248_v54 }
 0x20f   : > { %v4140_v48 = vrot.slane %v9896_v32, %v8248_v54  ;;  %5449 = vperm.xlu0 %7136, %v4066_v53   ;;  %v9898_v6 = vcombine.high %v8384_v51, %v8376_v5  ;;  %v8709_v43 = vadd.f32 %v8365_v62, %v8367_v26  ;;  %v8712_v37 = vrot.slane %v2954_v34, %v8248_v54  ;;  %v9903_v62 = vld [vmem:[#allocation29_spill] sm:$0xff] }
 0x210   : > { %9897 = vst [vmem:[#allocation28_spill] sm:$0xff] %v8700_v55  ;;  %v2906_v22 = vcombine.high %v2898_v36, %v2898_v36  ;;  %v3045_v33 = vrot.slane %v8617_v12, %v8248_v54  ;;  %v4148_v41 = vcombine.low %v8412_v45, %v8420_v9  ;;  %v4508_v25 = vcombine.low %v2963_v38, %v2977_v17  ;;  %v9937_v55 = vld [vmem:[#allocation38_spill] sm:$0xff] }
 0x211   : > { %v4147_v27 = vrot.slane %v9898_v6, %v8248_v54  ;;  %9899 = vst [vmem:[#allocation30_spill] sm:$0xff] %v8712_v37  ;;  %v5910_v5 = vcombine.high %v2963_v38, %v2977_v17  ;;  %v8723_v26 = vrot.slane %v4361_v63, %v8248_v54  ;;  %v8726_v34 = vrot.slane %v5904_v20, %v8248_v54 }
 0x212   : > { %v3052_v12 = vrot.slane %v3038_v1, %v8248_v54  ;;  %v2907_v10 = vcombine.high %v2905_v56, %v2905_v56  ;;  %v2928_v17 = vrot.slane %v2906_v22, %v8248_v54  ;;  %v3053_v53 = vcombine.high %v3045_v33, %v3045_v33 }
 0x213   : > { %v4149_v51 = vcombine.low %v4140_v48, %v4147_v27  ;;  %v2989_v32 = vcombine.high %v6930_v19, %v6930_v19  ;;  %v4156_v48 = vrot.slane %v4148_v41, %v8248_v54  ;;  %v8737_v63 = vrot.slane %v4508_v25, %v8248_v54 }
 0x214   : > { %v2914_v20 = vrot.slane %v2898_v36, %v8248_v54  ;;  %v8741_v1 = vrot.slane %v2905_v56, %v8248_v54  ;;  %v2996_v6 = vrot.slane %v6930_v19, %v8248_v54  ;;  %v3054_v27 = vcombine.high %v3052_v12, %v3052_v12 }
 0x215   : > { %v4163_v38 = vrot.slane %v4149_v51, %v8248_v54  ;;  %9900 = vst [vmem:[#allocation32_spill] sm:$0xff] %v8737_v63  ;;  %v3136_v51 = vcombine.high %v8673_v52, %v8673_v52  ;;  %v6933_v22 = vadd.f32 %v8392_v40, %v8390_v11  ;;  %v8749_v41 = vrot.slane %v2907_v10, %v8248_v54 }
 0x216   : > { %v3143_v25 = vrot.slane %v8673_v52, %v8248_v54  ;;  %v9901_v36 = vcombine.low %v8399_v39, %v8388_v14  ;;  %v9902_v19 = vcombine.high %v8399_v39, %v8388_v14  ;;  %v3075_v11 = vrot.slane %v3053_v53, %v8248_v54  ;;  %v9905_v39 = vld [vmem:[#allocation10_spill] sm:$0xff]  ;;  %v9907_v53 = vld [vmem:[#allocation21_spill] sm:$0xff] }
 0x217   : > { %v4164_v45 = vcombine.low %v4156_v48, %v4163_v38  ;;  %v4459_v38 = vcombine.low %v2914_v20, %v2928_v17  ;;  %v5908_v48 = vcombine.high %v2914_v20, %v2928_v17  ;;  %v3003_v40 = vrot.slane %v2989_v32, %v8248_v54  ;;  %v9908_v20 = vld [vmem:[#allocation23_spill] sm:$0xff] }
 0x218   : > { %v4091_v56 = vrot.slane %v9901_v36, %v8248_v54  ;;  %v4098_v9 = vrot.slane %v9902_v19, %v8248_v54  ;;  %v3061_v10 = vrot.slane %v3045_v33, %v8248_v54  ;;  %v3004_v52 = vcombine.high %v2996_v6, %v2996_v6  ;;  %v9906_v19 = vld [vmem:[#allocation20_spill] sm:$0xff] }
 0x219   : > { %5455 = vperm.xlu0 %7136, %v4164_v45   ;;  %v4099_v23 = vcombine.low %v9903_v62, %v8459_v2  ;;  %v8767_v36 = vrot.slane %v3054_v27, %v8248_v54  ;;  %v3150_v14 = vrot.slane %v3136_v51, %v8248_v54  ;;  %v8772_v17 = vadd.f32 %v9906_v19, %v9905_v39 }
 0x21a   : > { %v4100_v49 = vcombine.low %v4091_v56, %v4098_v9  ;;  %v8776_v32 = vadd.f32 %v9908_v20, %v9907_v53  ;;  %v8779_v33 = vrot.slane %v5910_v5, %v8248_v54  ;;  %v3151_v9 = vcombine.high %v3143_v25, %v3143_v25 }
 0x21b   : > { %9904 = vst [vmem:[#allocation33_spill] sm:$0xff] %v8767_v36  ;;  %v8786_v45 = vrot.slane %v3052_v12, %v8248_v54  ;;  %v4606_v27 = vcombine.low %v3061_v10, %v3075_v11  ;;  %v5914_v51 = vcombine.high %v3061_v10, %v3075_v11  ;;  %v3005_v56 = vcombine.high %v3003_v40, %v3003_v40 }
 0x21c   : > { %9909 = vst [vmem:[#allocation35_spill] sm:$0xff] %v8779_v33  ;;  %v3026_v39 = vrot.slane %v3004_v52, %v8248_v54  ;;  %v3087_v19 = vcombine.high %v8709_v43, %v8709_v43  ;;  %v4107_v5 = vrot.slane %v4099_v23, %v8248_v54  ;;  %v4114_v53 = vrot.slane %v4100_v49, %v8248_v54 }
 0x21d   : > { %9910 = vst [vmem:[#allocation39_spill] sm:$0xff] %v8786_v45  ;;  %v8794_v20 = vrot.slane %v4459_v38, %v8248_v54  ;;  %v8797_v62 = vrot.slane %v5908_v48, %v8248_v54  ;;  %v3152_v11 = vcombine.high %v3150_v14, %v3150_v14  ;;  %v3012_v52 = vrot.slane %v2996_v6, %v8248_v54 }
 0x21e   : > { %v3173_v2 = vrot.slane %v3151_v9, %v8248_v54  ;;  %v4115_v23 = vcombine.low %v4107_v5, %v4114_v53  ;;  %v8806_v49 = vrot.slane %v4606_v27, %v8248_v54  ;;  %v8809_v38 = vrot.slane %v5914_v51, %v8248_v54 }
 0x21f   : > { %v8812_v48 = vrot.slane %v3005_v56, %v8248_v54  ;;  %v3094_v12 = vrot.slane %v8709_v43, %v8248_v54  ;;  %v4557_v24 = vcombine.low %v3012_v52, %v3026_v39  ;;  %v3159_v10 = vrot.slane %v3143_v25, %v8248_v54 }
 0x220   : > { %9911 = vst [vmem:[#allocation40_spill] sm:$0xff] %v8806_v49  ;;  %9912 = vst [vmem:[#allocation41_spill] sm:$0xff] %v8809_v38  ;;  %v3101_v6 = vrot.slane %v3087_v19, %v8248_v54  ;;  %v3234_v36 = vcombine.high %v6933_v22, %v6933_v22  ;;  %5452 = vperm.xlu0 %7136, %v4115_v23   ;;  %v8819_v9 = vrot.slane %v3003_v40, %v8248_v54 }
 0x221   : > { %9913 = vst [vmem:[#allocation42_spill] sm:$0xff] %v8812_v48  ;;  %v5912_v27 = vcombine.high %v3012_v52, %v3026_v39  ;;  %v8822_v51 = vrot.slane %v3152_v11, %v8248_v54  ;;  %v3241_v56 = vrot.slane %v6933_v22, %v8248_v54  ;;  %v8826_v5 = vrot.slane %v3150_v14, %v8248_v54  ;;  %v9931_v48 = vld [vmem:[#allocation36_spill] sm:$0xff] }
 0x222   : > { %9914 = vst [vmem:[#allocation29_spill] sm:$0xff] %v8819_v9  ;;  %v4704_v43 = vcombine.low %v3159_v10, %v3173_v2  ;;  %v9915_v25 = vcombine.low %v8462_v18, %v8436_v21  ;;  %v9916_v40 = vcombine.high %v8462_v18, %v8436_v21  ;;  %v3102_v11 = vcombine.high %v3094_v12, %v3094_v12 }
 0x223   : > { %v4246_v14 = vcombine.low %v8490_v57, %v8538_v15  ;;  %v8843_v52 = vrot.slane %v4557_v24, %v8248_v54  ;;  %v3103_v23 = vcombine.high %v3101_v6, %v3101_v6  ;;  %v8847_v18 = vrot.slane %v5912_v27, %v8248_v54 }
 0x224   : > { %v4238_v19 = vrot.slane %v9915_v25, %v8248_v54  ;;  %v4245_v53 = vrot.slane %v9916_v40, %v8248_v54  ;;  %v3248_v25 = vrot.slane %v3234_v36, %v8248_v54  ;;  %v5918_v21 = vcombine.high %v3159_v10, %v3173_v2  ;;  %v9920_v2 = vld [vmem:[#allocation11_spill] sm:$0xff] }
 0x225   : > { %9917 = vst [vmem:[#allocation10_spill] sm:$0xff] %v8843_v52  ;;  %9918 = vst [vmem:[#allocation20_spill] sm:$0xff] %v8847_v18  ;;  %v3249_v39 = vcombine.high %v3241_v56, %v3241_v56  ;;  %v8854_v15 = vrot.slane %v4704_v43, %v8248_v54  ;;  %v3110_v57 = vrot.slane %v3094_v12, %v8248_v54 }
 0x226   : > { %v4247_v49 = vcombine.low %v4238_v19, %v4245_v53  ;;  %v3124_v36 = vrot.slane %v3102_v11, %v8248_v54  ;;  %v4254_v27 = vrot.slane %v4246_v14, %v8248_v54  ;;  %v9919_v19 = vld [vmem:[#allocation26_spill] sm:$0xff]  ;;  %v9921_v53 = vld [vmem:[#allocation13_spill] sm:$0xff]  ;;  %v8865_v38 = vrot.slane %v3103_v23, %v8248_v54 }
 0x227   : > { %v6936_v10 = vadd.f32 %v9920_v2, %v9919_v19  ;;  %v6937_v40 = vadd.f32 %v9921_v53, %v8471_v47  ;;  %v3250_v22 = vcombine.high %v3248_v25, %v3248_v25  ;;  %v9922_v12 = vcombine.low %v8487_v42, %v8533_v31 }
 0x228   : > { %v4261_v24 = vrot.slane %v4247_v49, %v8248_v54  ;;  %v9923_v49 = vcombine.high %v8487_v42, %v8533_v31  ;;  %v3271_v14 = vrot.slane %v3249_v39, %v8248_v54  ;;  %v3185_v19 = vcombine.high %v8772_v17, %v8772_v17 }
 0x229   : > { %v4189_v43 = vrot.slane %v9922_v12, %v8248_v54  ;;  %v3192_v47 = vrot.slane %v8772_v17, %v8248_v54  ;;  %v8881_v2 = vrot.slane %v5918_v21, %v8248_v54  ;;  %v8884_v53 = vrot.slane %v3101_v6, %v8248_v54  ;;  %v9925_v21 = vld [vmem:[#allocation16_spill] sm:$0xff] }
 0x22a   : > { %v4196_v11 = vrot.slane %v9923_v49, %v8248_v54  ;;  %v4262_v23 = vcombine.low %v4254_v27, %v4261_v24  ;;  %v3332_v12 = vcombine.high %v8776_v32, %v8776_v32  ;;  %v4197_v42 = vcombine.low %v8562_v46, %v8565_v30 }
 0x22b   : > { %v4655_v31 = vcombine.low %v3110_v57, %v3124_v36  ;;  %v5916_v39 = vcombine.high %v3110_v57, %v3124_v36  ;;  %v3257_v49 = vrot.slane %v3241_v56, %v8248_v54  ;;  %v3339_v17 = vrot.slane %v8776_v32, %v8248_v54 }
 0x22c   : > { %5461 = vperm.xlu0 %7136, %v4262_v23   ;;  %v8896_v6 = vrot.slane %v3248_v25, %v8248_v54  ;;  %v8899_v24 = vrot.slane %v3250_v22, %v8248_v54  ;;  %v4198_v27 = vcombine.low %v4189_v43, %v4196_v11  ;;  %v3199_v30 = vrot.slane %v3185_v19, %v8248_v54  ;;  %v9924_v23 = vld [vmem:[#allocation31_spill] sm:$0xff] }
 0x22d   : > { %v4802_v45 = vcombine.low %v3257_v49, %v3271_v14  ;;  %v5922_v46 = vcombine.high %v3257_v49, %v3271_v14  ;;  %v3200_v57 = vcombine.high %v3192_v47, %v3192_v47  ;;  %v3346_v56 = vrot.slane %v3332_v12, %v8248_v54 }
 0x22e   : > { %v4205_v32 = vrot.slane %v4197_v42, %v8248_v54  ;;  %v4212_v36 = vrot.slane %v4198_v27, %v8248_v54  ;;  %v6938_v52 = vadd.f32 %v9925_v21, %v9924_v23  ;;  %v8910_v22 = vrot.slane %v4655_v31, %v8248_v54 }
 0x22f   : > { %v8913_v43 = vrot.slane %v5916_v39, %v8248_v54  ;;  %v3347_v11 = vcombine.high %v3339_v17, %v3339_v17  ;;  %v3208_v12 = vrot.slane %v3192_v47, %v8248_v54  ;;  %v8921_v49 = vrot.slane %v4802_v45, %v8248_v54 }
 0x230   : > { %v4213_v42 = vcombine.low %v4205_v32, %v4212_v36  ;;  %v3201_v21 = vcombine.high %v3199_v30, %v3199_v30  ;;  %v3283_v27 = vcombine.high %v6936_v10, %v6936_v10  ;;  %v3290_v31 = vrot.slane %v6936_v10, %v8248_v54  ;;  %v9926_v32 = vld [vmem:[#allocation34_spill] sm:$0xff]  ;;  %v9927_v36 = vld [vmem:[#allocation19_spill] sm:$0xff] }
 0x231   : > { %v8925_v39 = vrot.slane %v5922_v46, %v8248_v54  ;;  %v3222_v23 = vrot.slane %v3200_v57, %v8248_v54  ;;  %v3348_v25 = vcombine.high %v3346_v56, %v3346_v56  ;;  %v3430_v14 = vcombine.high %v6937_v40, %v6937_v40 }
 0x232   : > { %5458 = vperm.xlu0 %7136, %v4213_v42   ;;  %v3369_v19 = vrot.slane %v3347_v11, %v8248_v54  ;;  %v3437_v47 = vrot.slane %v6937_v40, %v8248_v54  ;;  %v8932_v45 = vadd.f32 %v9927_v36, %v9926_v32  ;;  %v9928_v10 = vcombine.low %v8548_v3, %v8541_v8  ;;  %v9930_v11 = vld [vmem:[#allocation37_spill] sm:$0xff] }
 0x233   : > { %v9929_v46 = vcombine.high %v8548_v3, %v8541_v8  ;;  %v4344_v42 = vcombine.low %v8576_v50, %v8579_v44  ;;  %v8946_v40 = vadd.f32 %v9931_v48, %v9930_v11  ;;  %v8950_v32 = vadd.f32 %v8545_v7, %v8543_v16 }
 0x234   : > { %v4336_v18 = vrot.slane %v9928_v10, %v8248_v54  ;;  %v8953_v36 = vrot.slane %v3199_v30, %v8248_v54  ;;  %v8956_v10 = vrot.slane %v3201_v21, %v8248_v54  ;;  %v3297_v8 = vrot.slane %v3283_v27, %v8248_v54 }
 0x235   : > { %v4343_v57 = vrot.slane %v9929_v46, %v8248_v54  ;;  %v3298_v3 = vcombine.high %v3290_v31, %v3290_v31  ;;  %v4753_v46 = vcombine.low %v3208_v12, %v3222_v23  ;;  %v3355_v50 = vrot.slane %v3339_v17, %v8248_v54 }
 0x236   : > { %v3444_v44 = vrot.slane %v3430_v14, %v8248_v54  ;;  %v5920_v11 = vcombine.high %v3208_v12, %v3222_v23  ;;  %v8962_v9 = vrot.slane %v3346_v56, %v8248_v54  ;;  %v3445_v16 = vcombine.high %v3437_v47, %v3437_v47 }
 0x237   : > { %v4345_v48 = vcombine.low %v4336_v18, %v4343_v57  ;;  %v3381_v7 = vcombine.high %v6938_v52, %v6938_v52  ;;  %v8965_v30 = vrot.slane %v3348_v25, %v8248_v54  ;;  %v4900_v21 = vcombine.low %v3355_v50, %v3369_v19 }
 0x238   : > { %v4352_v63 = vrot.slane %v4344_v42, %v8248_v54  ;;  %v5926_v33 = vcombine.high %v3355_v50, %v3369_v19  ;;  %v3299_v14 = vcombine.high %v3297_v8, %v3297_v8  ;;  %v3320_v18 = vrot.slane %v3298_v3, %v8248_v54 }
 0x239   : > { %v4359_v27 = vrot.slane %v4345_v48, %v8248_v54  ;;  %v3446_v12 = vcombine.high %v3444_v44, %v3444_v44  ;;  %v3388_v23 = vrot.slane %v6938_v52, %v8248_v54  ;;  %v8976_v57 = vrot.slane %v4753_v46, %v8248_v54 }
 0x23a   : > { %v3306_v42 = vrot.slane %v3290_v31, %v8248_v54  ;;  %v3467_v48 = vrot.slane %v3445_v16, %v8248_v54  ;;  %v3395_v17 = vrot.slane %v3381_v7, %v8248_v54  ;;  %v8982_v19 = vrot.slane %v5920_v11, %v8248_v54 }
 0x23b   : > { %v4360_v25 = vcombine.low %v4352_v63, %v4359_v27  ;;  %v8989_v63 = vrot.slane %v4900_v21, %v8248_v54  ;;  %v8992_v52 = vrot.slane %v5926_v33, %v8248_v54  ;;  %v8995_v31 = vrot.slane %v3299_v14, %v8248_v54 }
 0x23c   : > { %v4851_v46 = vcombine.low %v3306_v42, %v3320_v18  ;;  %v3453_v11 = vrot.slane %v3437_v47, %v8248_v54  ;;  %v8999_v16 = vrot.slane %v3297_v8, %v8248_v54  ;;  %v5924_v7 = vcombine.high %v3306_v42, %v3320_v18  ;;  %v9936_v42 = vld [vmem:[#allocation9_spill] sm:$0xff] }
 0x23d   : > { %5467 = vperm.xlu0 %7136, %v4360_v25   ;;  %v9002_v27 = vrot.slane %v3446_v12, %v8248_v54  ;;  %v3396_v50 = vcombine.high %v3388_v23, %v3388_v23  ;;  %v9005_v21 = vrot.slane %v3444_v44, %v8248_v54  ;;  %v3397_v3 = vcombine.high %v3395_v17, %v3395_v17 }
 0x23e   : > { %v4998_v25 = vcombine.low %v3453_v11, %v3467_v48  ;;  %v5930_v33 = vcombine.high %v3453_v11, %v3467_v48  ;;  %v3528_v14 = vcombine.high %v8932_v45, %v8932_v45  ;;  %v3535_v47 = vrot.slane %v8932_v45, %v8248_v54 }
 0x23f   : > { %9932 = vst [vmem:[#allocation21_spill] sm:$0xff] %v9002_v27  ;;  %v9933_v8 = vcombine.low %v8588_v28, %v8591_v29  ;;  %v9934_v12 = vcombine.high %v8588_v28, %v8591_v29  ;;  %v9024_v11 = vrot.slane %v4851_v46, %v8248_v54  ;;  %v4295_v45 = vcombine.low %v8653_v35, %v8659_v61 }
 0x240   : > { %v9029_v56 = vrot.slane %v5924_v7, %v8248_v54  ;;  %v3404_v28 = vrot.slane %v3388_v23, %v8248_v54  ;;  %v3418_v29 = vrot.slane %v3396_v50, %v8248_v54  ;;  %v3479_v46 = vcombine.high %v8946_v40, %v8946_v40 }
 0x241   : > { %v4287_v18 = vrot.slane %v9933_v8, %v8248_v54  ;;  %v4294_v44 = vrot.slane %v9934_v12, %v8248_v54  ;;  %9935 = vst [vmem:[#allocation23_spill] sm:$0xff] %v9024_v11  ;;  %v9036_v12 = vrot.slane %v3397_v3, %v8248_v54  ;;  %v9042_v35 = vadd.f32 %v9937_v55, %v9936_v42  ;;  %v9940_v42 = vld [vmem:[#allocation12_spill] sm:$0xff] }
 0x242   : > { %v3542_v61 = vrot.slane %v3528_v14, %v8248_v54  ;;  %v3543_v7 = vcombine.high %v3535_v47, %v3535_v47  ;;  %v9938_v23 = vcombine.low %v8884_v53, %v8865_v38  ;;  %v9939_v3 = vcombine.high %v8884_v53, %v8865_v38  ;;  %v9941_v14 = vld [vmem:[#allocation14_spill] sm:$0xff] }
 0x243   : > { %v4296_v48 = vcombine.low %v4287_v18, %v4294_v44  ;;  %v3486_v18 = vrot.slane %v8946_v40, %v8248_v54  ;;  %v4303_v44 = vrot.slane %v4295_v45, %v8248_v54  ;;  %v9059_v37 = vadd.f32 %v9941_v14, %v9940_v42 }
 0x244   : > { %v4679_v8 = vrot.slane %v9938_v23, %v8248_v54  ;;  %v4686_v50 = vrot.slane %v9939_v3, %v8248_v54  ;;  %v9064_v23 = vrot.slane %v4998_v25, %v8248_v54  ;;  %v9067_v38 = vrot.slane %v5930_v33, %v8248_v54  ;;  %v9946_v25 = vld [vmem:[#allocation15_spill] sm:$0xff] }
 0x245   : > { %v4310_v55 = vrot.slane %v4296_v48, %v8248_v54  ;;  %v4687_v53 = vcombine.low %v8910_v22, %v8913_v43  ;;  %v9072_v40 = vrot.slane %v3395_v17, %v8248_v54  ;;  %v4949_v48 = vcombine.low %v3404_v28, %v3418_v29 }
 0x246   : > { %9942 = vst [vmem:[#allocation26_spill] sm:$0xff] %v9064_v23  ;;  %v3551_v45 = vrot.slane %v3535_v47, %v8248_v54  ;;  %v5928_v42 = vcombine.high %v3404_v28, %v3418_v29  ;;  %v3544_v14 = vcombine.high %v3542_v61, %v3542_v61  ;;  %v3565_v11 = vrot.slane %v3543_v7, %v8248_v54 }
 0x247   : > { %v4311_v3 = vcombine.low %v4303_v44, %v4310_v55  ;;  %v4688_v27 = vcombine.low %v4679_v8, %v4686_v50  ;;  %v3493_v33 = vrot.slane %v3479_v46, %v8248_v54  ;;  %v3494_v23 = vcombine.high %v3486_v18, %v3486_v18  ;;  %v9945_v46 = vld [vmem:[#allocation17_spill] sm:$0xff] }
 0x248   : > { %v3626_v22 = vcombine.high %v8950_v32, %v8950_v32  ;;  %v4695_v43 = vrot.slane %v4687_v53, %v8248_v54  ;;  %v9943_v47 = vcombine.low %v8624_v4, %v8635_v13  ;;  %v9944_v8 = vcombine.high %v8624_v4, %v8635_v13 }
 0x249   : > { %5464 = vperm.xlu0 %7136, %v4311_v3   ;;  %v4702_v17 = vrot.slane %v4688_v27, %v8248_v54  ;;  %v9094_v7 = vrot.slane %v4949_v48, %v8248_v54  ;;  %v9097_v50 = vrot.slane %v3542_v61, %v8248_v54  ;;  %v3633_v27 = vrot.slane %v8950_v32, %v8248_v54 }
 0x24a   : > { %v4434_v28 = vrot.slane %v9943_v47, %v8248_v54  ;;  %v4441_v29 = vrot.slane %v9944_v8, %v8248_v54  ;;  %v9102_v44 = vrot.slane %v5928_v42, %v8248_v54  ;;  %v9105_v55 = vrot.slane %v3544_v14, %v8248_v54 }
 0x24b   : > { %v5096_v4 = vcombine.low %v3551_v45, %v3565_v11  ;;  %v4703_v13 = vcombine.low %v4695_v43, %v4702_v17  ;;  %v5934_v53 = vcombine.high %v3551_v45, %v3565_v11  ;;  %v3495_v3 = vcombine.high %v3493_v33, %v3493_v33 }
 0x24c   : > { %v3502_v47 = vrot.slane %v3486_v18, %v8248_v54  ;;  %v4442_v48 = vcombine.low %v8666_v58, %v8680_v60  ;;  %v3516_v61 = vrot.slane %v3494_v23, %v8248_v54  ;;  %v3640_v8 = vrot.slane %v3626_v22, %v8248_v54 }
 0x24d   : > { %v3577_v32 = vcombine.high %v9042_v35, %v9042_v35  ;;  %5488 = vperm.xlu1 %7137, %v4703_v13   ;;  %v4443_v42 = vcombine.low %v4434_v28, %v4441_v29  ;;  %v3641_v14 = vcombine.high %v3633_v27, %v3633_v27  ;;  %v9116_v43 = vadd.f32 %v9946_v25, %v9945_v46 }
 0x24e   : > { %v9947_v11 = vcombine.low %v8896_v6, %v8899_v24  ;;  %v9948_v58 = vcombine.high %v8896_v6, %v8899_v24  ;;  %v9131_v22 = vrot.slane %v3493_v33, %v8248_v54  ;;  %v3584_v17 = vrot.slane %v9042_v35, %v8248_v54 }
 0x24f   : > { %v4457_v25 = vrot.slane %v4443_v42, %v8248_v54  ;;  %v4450_v28 = vrot.slane %v4442_v48, %v8248_v54  ;;  %v4834_v6 = vcombine.low %v8921_v49, %v8925_v39  ;;  %v9140_v29 = vrot.slane %v5096_v4, %v8248_v54  ;;  %v9949_v39 = vld [vmem:[#allocation22_spill] sm:$0xff]  ;;  %v9950_v4 = vld [vmem:[#allocation24_spill] sm:$0xff] }
 0x250   : > { %v4826_v18 = vrot.slane %v9947_v11, %v8248_v54  ;;  %v4833_v60 = vrot.slane %v9948_v58, %v8248_v54  ;;  %v9143_v46 = vrot.slane %v5934_v53, %v8248_v54  ;;  %v9146_v33 = vrot.slane %v3495_v3, %v8248_v54 }
 0x251   : > { %v3591_v13 = vrot.slane %v3577_v32, %v8248_v54  ;;  %v5047_v42 = vcombine.low %v3502_v47, %v3516_v61  ;;  %v3642_v11 = vcombine.high %v3640_v8, %v3640_v8  ;;  %v3663_v35 = vrot.slane %v3641_v14, %v8248_v54 }
 0x252   : > { %v4835_v24 = vcombine.low %v4826_v18, %v4833_v60  ;;  %v4458_v48 = vcombine.low %v4450_v28, %v4457_v25  ;;  %v4842_v58 = vrot.slane %v4834_v6, %v8248_v54  ;;  %v9154_v18 = vadd.f32 %v9950_v4, %v9949_v39 }
 0x253   : > { %v9951_v53 = vcombine.low %v8695_v59, %v8687_v0  ;;  %v3649_v32 = vrot.slane %v3633_v27, %v8248_v54  ;;  %v3592_v60 = vcombine.high %v3584_v17, %v3584_v17  ;;  %v3724_v14 = vcombine.high %v9059_v37, %v9059_v37 }
 0x254   : > { %v4849_v49 = vrot.slane %v4835_v24, %v8248_v54  ;;  %5473 = vperm.xlu0 %7136, %v4458_v48   ;;  %v9952_v25 = vcombine.high %v8695_v59, %v8687_v0  ;;  %v3593_v6 = vcombine.high %v3591_v13, %v3591_v13  ;;  %v3731_v24 = vrot.slane %v9059_v37, %v8248_v54 }
 0x255   : > { %v4385_v3 = vrot.slane %v9951_v53, %v8248_v54  ;;  %v4393_v4 = vcombine.low %v8723_v26, %v8726_v34  ;;  %v5932_v53 = vcombine.high %v3502_v47, %v3516_v61  ;;  %v5049_v27 = vcombine.low %v9131_v22, %v9146_v33 }
 0x256   : > { %v4392_v28 = vrot.slane %v9952_v25, %v8248_v54  ;;  %v4850_v39 = vcombine.low %v4842_v58, %v4849_v49  ;;  %v5933_v48 = vcombine.high %v9131_v22, %v9146_v33  ;;  %v9176_v23 = vrot.slane %v5047_v42, %v8248_v54 }
 0x257   : > { %v9179_v0 = vrot.slane %v3640_v8, %v8248_v54  ;;  %v9182_v59 = vrot.slane %v3642_v11, %v8248_v54  ;;  %v5194_v37 = vcombine.low %v3649_v32, %v3663_v35  ;;  %v5938_v26 = vcombine.high %v3649_v32, %v3663_v35  ;;  %v9954_v11 = vld [vmem:[#allocation25_spill] sm:$0xff] }
 0x258   : > { %v4394_v45 = vcombine.low %v4385_v3, %v4392_v28  ;;  %5497 = vperm.xlu1 %7137, %v4850_v39   ;;  %v3600_v34 = vrot.slane %v3584_v17, %v8248_v54  ;;  %v3614_v47 = vrot.slane %v3592_v60, %v8248_v54  ;;  %v3738_v61 = vrot.slane %v3724_v14, %v8248_v54  ;;  %v9953_v3 = vld [vmem:[#allocation27_spill] sm:$0xff] }
 0x259   : > { %v9188_v58 = vrot.slane %v3593_v6, %v8248_v54  ;;  %v3739_v42 = vcombine.high %v3731_v24, %v3731_v24  ;;  %v4401_v49 = vrot.slane %v4393_v4, %v8248_v54  ;;  %v9194_v25 = vadd.f32 %v9954_v11, %v9953_v3 }
 0x25a   : > { %v4408_v8 = vrot.slane %v4394_v45, %v8248_v54  ;;  %v9955_v17 = vcombine.low %v8953_v36, %v8956_v10  ;;  %v9956_v32 = vcombine.high %v8953_v36, %v8956_v10  ;;  %v4785_v14 = vcombine.low %v8976_v57, %v8982_v19 }
 0x25b   : > { %v9207_v28 = vrot.slane %v5932_v53, %v8248_v54  ;;  %v5196_v45 = vcombine.low %v9179_v0, %v9182_v59  ;;  %v5939_v6 = vcombine.high %v9179_v0, %v9182_v59  ;;  %v9214_v4 = vrot.slane %v3591_v13, %v8248_v54 }
 0x25c   : > { %v4777_v35 = vrot.slane %v9955_v17, %v8248_v54  ;;  %v4784_v60 = vrot.slane %v9956_v32, %v8248_v54  ;;  %v4409_v39 = vcombine.low %v4401_v49, %v4408_v8  ;;  %v5145_v3 = vcombine.low %v3600_v34, %v3614_v47 }
 0x25d   : > { %v3740_v11 = vcombine.high %v3738_v61, %v3738_v61  ;;  %v9217_v10 = vrot.slane %v5194_v37, %v8248_v54  ;;  %v9220_v57 = vrot.slane %v5938_v26, %v8248_v54  ;;  %v5936_v19 = vcombine.high %v3600_v34, %v3614_v47 }
 0x25e   : > { %v4786_v36 = vcombine.low %v4777_v35, %v4784_v60  ;;  %v9223_v53 = vrot.slane %v3731_v24, %v8248_v54  ;;  %5470 = vperm.xlu0 %7136, %v4409_v39   ;;  %v5147_v49 = vcombine.low %v9214_v4, %v9188_v58  ;;  %v9228_v13 = vrot.slane %v3739_v42, %v8248_v54 }
 0x25f   : > { %v4793_v8 = vrot.slane %v4785_v14, %v8248_v54  ;;  %v9957_v37 = vcombine.low %v8826_v5, %v8822_v51  ;;  %v9958_v24 = vcombine.high %v8826_v5, %v8822_v51  ;;  %v4736_v47 = vcombine.low %v8854_v15, %v8881_v2 }
 0x260   : > { %v4800_v17 = vrot.slane %v4786_v36, %v8248_v54  ;;  %v9959_v42 = vcombine.low %v8962_v9, %v8965_v30  ;;  %v5937_v32 = vcombine.high %v9214_v4, %v9188_v58  ;;  %v9249_v60 = vrot.slane %v5145_v3, %v8248_v54 }
 0x261   : > { %v4728_v26 = vrot.slane %v9957_v37, %v8248_v54  ;;  %v4735_v34 = vrot.slane %v9958_v24, %v8248_v54  ;;  %v9252_v14 = vrot.slane %v3740_v11, %v8248_v54  ;;  %v9255_v51 = vrot.slane %v5936_v19, %v8248_v54 }
 0x262   : > { %v4924_v35 = vrot.slane %v9959_v42, %v8248_v54  ;;  %v4801_v39 = vcombine.low %v4793_v8, %v4800_v17  ;;  %v9960_v15 = vcombine.high %v8962_v9, %v8965_v30  ;;  %v4932_v36 = vcombine.low %v8989_v63, %v8992_v52 }
 0x263   : > { %v4737_v5 = vcombine.low %v4728_v26, %v4735_v34  ;;  %v9264_v37 = vrot.slane %v3738_v61, %v8248_v54  ;;  %v5292_v3 = vcombine.low %v9223_v53, %v9228_v13  ;;  %v5942_v11 = vcombine.high %v9223_v53, %v9228_v13 }
 0x264   : > { %v4931_v2 = vrot.slane %v9960_v15, %v8248_v54  ;;  %5494 = vperm.xlu1 %7137, %v4801_v39   ;;  %v9961_v19 = vcombine.low %v8741_v1, %v8749_v41  ;;  %v4744_v9 = vrot.slane %v4736_v47, %v8248_v54  ;;  %v9962_v52 = vcombine.high %v8741_v1, %v8749_v41  ;;  %v9965_v15 = vld [vmem:[#allocation23_spill] sm:$0xff] }
 0x265   : > { %v4751_v30 = vrot.slane %v4737_v5, %v8248_v54  ;;  %v5294_v17 = vcombine.low %v9264_v37, %v9252_v14  ;;  %v3675_v26 = vcombine.high %v9116_v43, %v9116_v43  ;;  %v9286_v24 = vrot.slane %v9116_v43, %v8248_v54 }
 0x266   : > { %v4483_v8 = vrot.slane %v9961_v19, %v8248_v54  ;;  %v4933_v63 = vcombine.low %v4924_v35, %v4931_v2  ;;  %v4490_v61 = vrot.slane %v9962_v52, %v8248_v54  ;;  %v4940_v34 = vrot.slane %v4932_v36, %v8248_v54  ;;  %v9966_v36 = vld [vmem:[#allocation30_spill] sm:$0xff]  ;;  %v9967_v19 = vld [vmem:[#allocation28_spill] sm:$0xff]  ;;  %v9970_v52 = vld [vmem:[#allocation35_spill] sm:$0xff] }
 0x267   : > { %v4752_v47 = vcombine.low %v4744_v9, %v4751_v30  ;;  %v4491_v35 = vcombine.low %v8794_v20, %v8797_v62  ;;  %v9963_v41 = vcombine.low %v8999_v16, %v8995_v31  ;;  %v9964_v5 = vcombine.high %v8999_v16, %v8995_v31 }
 0x268   : > { %v4947_v42 = vrot.slane %v4933_v63, %v8248_v54  ;;  %v4492_v1 = vcombine.low %v4483_v8, %v4490_v61  ;;  %v4883_v2 = vcombine.low %v9965_v15, %v9029_v56  ;;  %v9968_v9 = vcombine.low %v9966_v36, %v9967_v19  ;;  %v9971_v61 = vld [vmem:[#allocation32_spill] sm:$0xff] }
 0x269   : > { %v4875_v39 = vrot.slane %v9963_v41, %v8248_v54  ;;  %v4882_v43 = vrot.slane %v9964_v5, %v8248_v54  ;;  %5491 = vperm.xlu0 %7136, %v4752_v47   ;;  %v4499_v20 = vrot.slane %v4491_v35, %v8248_v54  ;;  %v9969_v63 = vcombine.high %v9966_v36, %v9967_v19  ;;  %v9972_v47 = vld [vmem:[#allocation21_spill] sm:$0xff] }
 0x26a   : > { %v4532_v30 = vrot.slane %v9968_v9, %v8248_v54  ;;  %v4948_v62 = vcombine.low %v4940_v34, %v4947_v42  ;;  %v4506_v8 = vrot.slane %v4492_v1, %v8248_v54  ;;  %v9313_v16 = vrot.slane %v3675_v26, %v8248_v54  ;;  %v9975_v26 = vld [vmem:[#allocation26_spill] sm:$0xff]  ;;  %v9976_v19 = vld [vmem:[#allocation29_spill] sm:$0xff] }
 0x26b   : > { %v4539_v31 = vrot.slane %v9969_v63, %v8248_v54  ;;  %v4884_v56 = vcombine.low %v4875_v39, %v4882_v43  ;;  %v4540_v41 = vcombine.low %v9971_v61, %v9970_v52  ;;  %v9973_v34 = vcombine.low %v9005_v21, %v9972_v47  ;;  %v9977_v9 = vld [vmem:[#allocation42_spill] sm:$0xff] }
 0x26c   : > { %5503 = vperm.xlu1 %7137, %v4948_v62   ;;  %v4507_v35 = vcombine.low %v4499_v20, %v4506_v8  ;;  %v9974_v5 = vcombine.high %v9005_v21, %v9972_v47  ;;  %v5030_v36 = vcombine.low %v9975_v26, %v9067_v38  ;;  %v4891_v39 = vrot.slane %v4883_v2, %v8248_v54  ;;  %v9980_v8 = vld [vmem:[#allocation20_spill] sm:$0xff]  ;;  %v9981_v2 = vld [vmem:[#allocation10_spill] sm:$0xff] }
 0x26d   : > { %v5022_v42 = vrot.slane %v9973_v34, %v8248_v54  ;;  %v4541_v1 = vcombine.low %v4532_v30, %v4539_v31  ;;  %v4898_v43 = vrot.slane %v4884_v56, %v8248_v54  ;;  %v9978_v63 = vcombine.low %v9976_v19, %v9977_v9 }
 0x26e   : > { %v5029_v15 = vrot.slane %v9974_v5, %v8248_v54  ;;  %v9979_v30 = vcombine.high %v9976_v19, %v9977_v9  ;;  %5476 = vperm.xlu0 %7136, %v4507_v35   ;;  %v4548_v21 = vrot.slane %v4540_v41, %v8248_v54  ;;  %v4589_v31 = vcombine.low %v9981_v2, %v9980_v8  ;;  %v9985_v19 = vld [vmem:[#allocation33_spill] sm:$0xff] }
 0x26f   : > { %v4581_v52 = vrot.slane %v9978_v63, %v8248_v54  ;;  %v4555_v20 = vrot.slane %v4541_v1, %v8248_v54  ;;  %v4899_v56 = vcombine.low %v4891_v39, %v4898_v43  ;;  %v9982_v47 = vcombine.low %v9072_v40, %v9036_v12  ;;  %v9984_v43 = vld [vmem:[#allocation39_spill] sm:$0xff] }
 0x270   : > { %v4588_v62 = vrot.slane %v9979_v30, %v8248_v54  ;;  %v5031_v38 = vcombine.low %v5022_v42, %v5029_v15  ;;  %v9983_v5 = vcombine.high %v9072_v40, %v9036_v12  ;;  %v5038_v41 = vrot.slane %v5030_v36, %v8248_v54 }
 0x271   : > { %v4973_v34 = vrot.slane %v9982_v47, %v8248_v54  ;;  %v4556_v26 = vcombine.low %v4548_v21, %v4555_v20  ;;  %v4981_v1 = vcombine.low %v9094_v7, %v9102_v44  ;;  %5500 = vperm.xlu1 %7137, %v4899_v56   ;;  %v9986_v9 = vcombine.low %v9984_v43, %v9985_v19  ;;  %v9988_v44 = vld [vmem:[#allocation41_spill] sm:$0xff] }
 0x272   : > { %v4590_v61 = vcombine.low %v4581_v52, %v4588_v62  ;;  %v4980_v35 = vrot.slane %v9983_v5, %v8248_v54  ;;  %v5045_v42 = vrot.slane %v5031_v38, %v8248_v54  ;;  %v9987_v12 = vcombine.high %v9984_v43, %v9985_v19  ;;  %v9989_v52 = vld [vmem:[#allocation40_spill] sm:$0xff] }
 0x273   : > { %v4630_v63 = vrot.slane %v9986_v9, %v8248_v54  ;;  %v3773_v36 = vcombine.high %v9194_v25, %v9194_v25  ;;  %5479 = vperm.xlu0 %7136, %v4556_v26   ;;  %v4597_v7 = vrot.slane %v4589_v31, %v8248_v54  ;;  %v4638_v30 = vcombine.low %v9989_v52, %v9988_v44 }
 0x274   : > { %v4604_v15 = vrot.slane %v4590_v61, %v8248_v54  ;;  %v4982_v39 = vcombine.low %v4973_v34, %v4980_v35  ;;  %v4637_v40 = vrot.slane %v9987_v12, %v8248_v54  ;;  %v9990_v62 = vcombine.low %v9097_v50, %v9105_v55 }
 0x275   : > { %v5046_v20 = vcombine.low %v5038_v41, %v5045_v42  ;;  %v9991_v2 = vcombine.high %v9097_v50, %v9105_v55  ;;  %v3822_v31 = vcombine.high %v9154_v18, %v9154_v18  ;;  %v5071_v47 = vrot.slane %v5049_v27, %v8248_v54 }
 0x276   : > { %v5120_v21 = vrot.slane %v9990_v62, %v8248_v54  ;;  %v4996_v38 = vrot.slane %v4982_v39, %v8248_v54  ;;  %v4639_v8 = vcombine.low %v4630_v63, %v4637_v40  ;;  %v4605_v61 = vcombine.low %v4597_v7, %v4604_v15 }
 0x277   : > { %v5127_v56 = vrot.slane %v9991_v2, %v8248_v54  ;;  %v5078_v34 = vrot.slane %v5933_v48, %v8248_v54  ;;  %5509 = vperm.xlu1 %7137, %v5046_v20   ;;  %v4989_v5 = vrot.slane %v4981_v1, %v8248_v54  ;;  %v5128_v55 = vcombine.low %v9140_v29, %v9143_v46 }
 0x278   : > { %v4653_v50 = vrot.slane %v4639_v8, %v8248_v54  ;;  %v3691_v26 = vcombine.high %v9313_v16, %v9313_v16  ;;  %v3787_v41 = vrot.slane %v3773_v36, %v8248_v54  ;;  %5482 = vperm.xlu0 %7136, %v4605_v61   ;;  %v4646_v27 = vrot.slane %v4638_v30, %v8248_v54 }
 0x279   : > { %v5129_v35 = vcombine.low %v5120_v21, %v5127_v56  ;;  %v5080_v42 = vcombine.low %v5071_v47, %v5078_v34  ;;  %v4997_v22 = vcombine.low %v4989_v5, %v4996_v38  ;;  %v5218_v48 = vrot.slane %v5196_v45, %v8248_v54 }
 0x27a   : > { %v5225_v29 = vrot.slane %v5939_v6, %v8248_v54  ;;  %v5943_v46 = vcombine.high %v9264_v37, %v9252_v14  ;;  %v9409_v1 = vrot.slane %v5292_v3, %v8248_v54  ;;  %v3690_v15 = vcombine.high %v9286_v24, %v9286_v24 }
 0x27b   : > { %v5143_v33 = vrot.slane %v5129_v35, %v8248_v54  ;;  %v4654_v39 = vcombine.low %v4646_v27, %v4653_v50  ;;  %v3836_v45 = vrot.slane %v3822_v31, %v8248_v54  ;;  %v3780_v43 = vrot.slane %v9194_v25, %v8248_v54  ;;  %5506 = vperm.xlu1 %7137, %v4997_v22  }
 0x27c   : > { %v5136_v0 = vrot.slane %v5128_v55, %v8248_v54  ;;  %v5079_v59 = vcombine.low %v9176_v23, %v9207_v28  ;;  %v9423_v6 = vrot.slane %v5942_v11, %v8248_v54  ;;  %v3719_v3 = vrot.slane %v3691_v26, %v8248_v54 }
 0x27d   : > { %v3789_v19 = vcombine.high %v3787_v41, %v3787_v41  ;;  %5485 = vperm.xlu0 %7136, %v4654_v39   ;;  %v5094_v9 = vrot.slane %v5080_v42, %v8248_v54  ;;  %v5227_v25 = vcombine.low %v5218_v48, %v5225_v29  ;;  %v5169_v12 = vrot.slane %v5147_v49, %v8248_v54 }
 0x27e   : > { %v5144_v63 = vcombine.low %v5136_v0, %v5143_v33  ;;  %v5176_v23 = vrot.slane %v5937_v32, %v8248_v54  ;;  %v3698_v28 = vrot.slane %v9286_v24, %v8248_v54  ;;  %v3705_v53 = vrot.slane %v9313_v16, %v8248_v54 }
 0x27f   : > { %v3712_v13 = vrot.slane %v3690_v15, %v8248_v54  ;;  %v3829_v11 = vrot.slane %v9154_v18, %v8248_v54  ;;  %v3838_v40 = vcombine.high %v3836_v45, %v3836_v45  ;;  %v3788_v36 = vcombine.high %v3780_v43, %v3780_v43 }
 0x280   : > { %5515 = vperm.xlu1 %7137, %v5144_v63   ;;  %v5087_v49 = vrot.slane %v5079_v59, %v8248_v54  ;;  %v5226_v58 = vcombine.low %v9217_v10, %v9220_v57  ;;  %v5245_v4 = vcombine.low %v3705_v53, %v3719_v3  ;;  %v5941_v32 = vcombine.high %v3705_v53, %v3719_v3 }
 0x281   : > { %v3817_v24 = vrot.slane %v3789_v19, %v8248_v54  ;;  %v5316_v16 = vrot.slane %v5294_v17, %v8248_v54  ;;  %v5241_v18 = vrot.slane %v5227_v25, %v8248_v54  ;;  %v5178_v44 = vcombine.low %v5169_v12, %v5176_v23 }
 0x282   : > { %v5095_v7 = vcombine.low %v5087_v49, %v5094_v9  ;;  %v5323_v52 = vrot.slane %v5943_v46, %v8248_v54  ;;  %v5243_v30 = vcombine.low %v3698_v28, %v3712_v13  ;;  %v5940_v62 = vcombine.high %v3698_v28, %v3712_v13 }
 0x283   : > { %v3837_v21 = vcombine.high %v3829_v11, %v3829_v11  ;;  %v3803_v10 = vrot.slane %v3787_v41, %v8248_v54  ;;  %v3866_v57 = vrot.slane %v3838_v40, %v8248_v54  ;;  %v3810_v20 = vrot.slane %v3788_v36, %v8248_v54 }
 0x284   : > { %5512 = vperm.xlu1 %7137, %v5095_v7   ;;  %v5234_v38 = vrot.slane %v5226_v58, %v8248_v54  ;;  %v5177_v14 = vcombine.low %v9249_v60, %v9255_v51  ;;  %v3796_v37 = vrot.slane %v3780_v43, %v8248_v54  ;;  %v5267_v8 = vrot.slane %v5245_v4, %v8248_v54  ;;  %v5444_v7 = vpop.permute.xlu0 %5443 }
 0x285   : > { %v5343_v17 = vcombine.low %v3803_v10, %v3817_v24  ;;  %v5274_v2 = vrot.slane %v5941_v32, %v8248_v54  ;;  %v5945_v56 = vcombine.high %v3803_v10, %v3817_v24  ;;  %v5192_v61 = vrot.slane %v5178_v44, %v8248_v54 }
 0x286   : > { %v5242_v31 = vcombine.low %v5234_v38, %v5241_v18  ;;  %v5325_v47 = vcombine.low %v5316_v16, %v5323_v52  ;;  %v5253_v34 = vrot.slane %v5243_v30, %v8248_v54  ;;  %v5260_v5 = vrot.slane %v5940_v62, %v8248_v54 }
 0x287   : > { %v3852_v50 = vrot.slane %v3836_v45, %v8248_v54  ;;  %v3859_v60 = vrot.slane %v3837_v21, %v8248_v54  ;;  %v5341_v51 = vcombine.low %v3796_v37, %v3810_v20  ;;  %v5944_v55 = vcombine.high %v3796_v37, %v3810_v20 }
 0x288   : > { %5521 = vperm.xlu1 %7137, %v5242_v31   ;;  %v5185_v35 = vrot.slane %v5177_v14, %v8248_v54  ;;  %v5324_v26 = vcombine.low %v9409_v1, %v9423_v6  ;;  %v3845_v41 = vrot.slane %v3829_v11, %v8248_v54  ;;  %v5276_v22 = vcombine.low %v5267_v8, %v5274_v2  ;;  %v5441_v18 = vpop.permute.xlu0 %5440 }
 0x289   : > { %v5392_v27 = vcombine.low %v3852_v50, %v3866_v57  ;;  %v5947_v42 = vcombine.high %v3852_v50, %v3866_v57  ;;  %v5339_v48 = vrot.slane %v5325_v47, %v8248_v54  ;;  %v5365_v29 = vrot.slane %v5343_v17, %v8248_v54  ;;  %v9995_v50 = vld [vmem:[#allocation18_spill] sm:$0xff] }
 0x28a   : > { %v5193_v33 = vcombine.low %v5185_v35, %v5192_v61  ;;  %v5372_v46 = vrot.slane %v5945_v56, %v8248_v54  ;;  %v5390_v15 = vcombine.low %v3845_v41, %v3859_v60  ;;  %v5946_v39 = vcombine.high %v3845_v41, %v3859_v60 }
 0x28b   : > { %v5351_v45 = vrot.slane %v5341_v51, %v8248_v54  ;;  %v5358_v43 = vrot.slane %v5944_v55, %v8248_v54  ;;  %v5332_v1 = vrot.slane %v5324_v26, %v8248_v54  ;;  %v5275_v0 = vcombine.low %v5253_v34, %v5260_v5 }
 0x28c   : > { %5518 = vperm.xlu1 %7137, %v5193_v33   ;;  %v5290_v59 = vrot.slane %v5276_v22, %v8248_v54  ;;  %v5374_v3 = vcombine.low %v5365_v29, %v5372_v46  ;;  %v5414_v19 = vrot.slane %v5392_v27, %v8248_v54  ;;  %v5421_v9 = vrot.slane %v5947_v42, %v8248_v54  ;;  %v5447_v21 = vpop.permute.xlu1 %5446 }
 0x28d   : > { %v5340_v6 = vcombine.low %v5332_v1, %v5339_v48  ;;  %v5400_v63 = vrot.slane %v5390_v15, %v8248_v54  ;;  %v5407_v25 = vrot.slane %v5946_v39, %v8248_v54  ;;  %v5283_v12 = vrot.slane %v5275_v0, %v8248_v54 }
 0x28e   : > { %v5373_v23 = vcombine.low %v5351_v45, %v5358_v43  ;;  %v5388_v53 = vrot.slane %v5374_v3, %v8248_v54  ;;  %v5423_v13 = vcombine.low %v5414_v19, %v5421_v9  ;;  %v9992_v32 = vlaneseq  ;;  %v5450_v44 = vpop.permute.xlu0 %5449 }
 0x28f   : > { %v5291_v28 = vcombine.low %v5283_v12, %v5290_v59  ;;  %v5422_v40 = vcombine.low %v5400_v63, %v5407_v25  ;;  %v7257_v16 = vmov 0.0  }
 0x290   : > { %5527 = vperm.xlu1 %7137, %v5340_v6   ;;  %v5381_v11 = vrot.slane %v5373_v23, %v8248_v54  ;;  %v5437_v49 = vrot.slane %v5423_v13, %v8248_v54  ;;  %vm9488_vm0 = vcmp.lt.s32.totalorder %v9992_v32, 256  ;;  %v9514_v56 = vand.u32 127, %v9992_v32 }
 0x291   : > { %v5430_v58 = vrot.slane %v5422_v40, %v8248_v54  ;;  %247 = vst.msk [vmem:[%s9492_s5] sm:$0x3] %vm9488_vm0, %v7257_v16 }
 0x292   : > { %v5389_v36 = vcombine.low %v5381_v11, %v5388_v53  ;;  %v5541_v47 = vadd.s32 4294967288, %v9514_v56  ;;  %v5548_v51 = vadd.s32 4294967280, %v9514_v56  ;;  %v5539_v55 = vsub.s32 %v9514_v56, %v9995_v50 }
 0x293   : > { %v5438_v4 = vcombine.low %v5430_v58, %v5437_v49  ;;  %v5555_v35 = vadd.s32 4294967272, %v9514_v56  ;;  %v5562_v41 = vadd.s32 4294967264, %v9514_v56  ;;  %v5576_v15 = vadd.s32 4294967248, %v9514_v56 }
 0x294   : > { %5524 = vperm.xlu1 %7137, %v5291_v28   ;;  %v5544_v60 = vsub.s32 %v5541_v47, %v9995_v50  ;;  %v5551_v22 = vsub.s32 %v5548_v51, %v9995_v50  ;;  %v5540_v33 = vrot.slane %v5441_v18, %v5539_v55  ;;  %v5569_v1 = vadd.s32 4294967256, %v9514_v56 }
 0x295   : > { %v5558_v48 = vsub.s32 %v5555_v35, %v9995_v50  ;;  %v5565_v46 = vsub.s32 %v5562_v41, %v9995_v50  ;;  %v5579_v12 = vsub.s32 %v5576_v15, %v9995_v50  ;;  %v5590_v23 = vadd.s32 4294967232, %v9514_v56 }
 0x296   : > { %v5545_v43 = vrot.slane %v5444_v7, %v5544_v60  ;;  %v5552_v0 = vrot.slane %v5447_v21, %v5551_v22  ;;  %v5572_v53 = vsub.s32 %v5569_v1, %v9995_v50  ;;  %v5583_v13 = vadd.s32 4294967240, %v9514_v56 }
 0x297   : > { %v5559_v9 = vrot.slane %v5450_v44, %v5558_v48  ;;  %v5593_v7 = vsub.s32 %v5590_v23, %v9995_v50  ;;  %v5604_v18 = vadd.s32 4294967216, %v9514_v56  ;;  %v5611_v47 = vadd.s32 4294967208, %v9514_v56 }
 0x298   : > { %5530 = vperm.xlu1 %7137, %v5389_v36   ;;  %v9497_v52 = vpop.permute.xlu0 %5455  ;;  %v5547_v19 = vsel %vm5546_vm1, %v5545_v43, %v5540_v33  ;;  %v5618_v51 = vadd.s32 4294967200, %v9514_v56  ;;  %v5625_v41 = vadd.s32 4294967192, %v9514_v56 }
 0x299   : > { %v5554_v40 = vsel %vm5553_vm2, %v5552_v0, %v5547_v19  ;;  %v5573_v21 = vrot.slane %v9497_v52, %v5572_v53  ;;  %v5614_v1 = vsub.s32 %v5611_v47, %v9995_v50 }
 0x29a   : > { %v5561_v58 = vsel %vm5560_vm3, %v5559_v9, %v5554_v40  ;;  %v5628_v0 = vsub.s32 %v5625_v41, %v9995_v50 }
 0x29c   : > { %5533 = vperm.xlu1 %7137, %v5438_v4  }
 0x29f   : > { %v9499_v30 = vpop.permute.xlu0 %5452 }
 0x2a0   : > { %v5566_v25 = vrot.slane %v9499_v30, %v5565_v46 }
 0x2a2   : > { %v5568_v32 = vsel %vm5567_vm4, %v5566_v25, %v5561_v58 }
 0x2ab   : > { %v9501_v62 = vpop.permute.xlu0 %5461 }
 0x2b1   : > { %v9503_v57 = vpop.permute.xlu0 %5458 }
 0x2b2   : > { %v5580_v16 = vrot.slane %v9503_v57, %v5579_v12  ;;  %v5575_v57 = vsel %vm5574_vm5, %v5573_v21, %v5568_v32 }
 0x2bc   : > { %v9505_v38 = vpop.permute.xlu0 %5467 }
 0x2c8   : > { %v9507_v37 = vpop.permute.xlu0 %5464 }
 0x2c9   : > { %v5594_v52 = vrot.slane %v9507_v37, %v5593_v7 }
 0x2cc   : > { %v5489_v10 = vpop.permute.xlu1 %5488 }
 0x2cd   : > { %v5649_v42 = vrot.slane %v5489_v10, %v5539_v55  ;;  %v5586_v10 = vsub.s32 %v5583_v13, %v9995_v50 }
 0x2cf   : > { %v5587_v35 = vrot.slane %v9501_v62, %v5586_v10 }
 0x2d3   : > { %v9511_v8 = vpop.permute.xlu0 %5473 }
 0x2d4   : > { %v5615_v23 = vrot.slane %v9511_v8, %v5614_v1 }
 0x2d7   : > { %v5498_v20 = vpop.permute.xlu1 %5497 }
 0x2d8   : > { %v5663_v63 = vrot.slane %v5498_v20, %v5558_v48  ;;  %v5597_v20 = vadd.s32 4294967224, %v9514_v56 }
 0x2dd   : > { %v9516_v31 = vpop.permute.xlu0 %5470 }
 0x2e3   : > { %v5495_v14 = vpop.permute.xlu1 %5494 }
 0x2e4   : > { %v5658_v39 = vrot.slane %v5495_v14, %v5551_v22  ;;  %v5632_v22 = vadd.s32 4294967184, %v9514_v56 }
 0x2e8   : > { %v5492_v34 = vpop.permute.xlu0 %5491 }
 0x2e9   : > { %v5653_v26 = vrot.slane %v5492_v34, %v5544_v60  ;;  %v5607_v60 = vsub.s32 %v5604_v18, %v9995_v50 }
 0x2eb   : > { %v9509_v17 = vpop.permute.xlu1 %5503  ;;  %v5654_v29 = vsel %vm5546_vm1, %v5653_v26, %v5649_v42  ;;  %v5600_v26 = vsub.s32 %v5597_v20, %v9995_v50  ;;  %v5608_v15 = vrot.slane %v9516_v31, %v5607_v60 }
 0x2ec   : > { %v5659_v59 = vsel %vm5553_vm2, %v5658_v39, %v5654_v29  ;;  %v5673_v4 = vrot.slane %v9509_v17, %v5572_v53  ;;  %v5639_v29 = vadd.s32 4294967176, %v9514_v56  ;;  %v5621_v39 = vsub.s32 %v5618_v51, %v9995_v50 }
 0x2ed   : > { %v9536_v6 = vpop.permute.xlu0 %5476  ;;  %v5664_v11 = vsel %vm5560_vm3, %v5663_v63, %v5659_v59  ;;  %v5601_v43 = vrot.slane %v9505_v38, %v5600_v26 }
 0x2ee   : > { %v5642_v9 = vsub.s32 %v5639_v29, %v9995_v50  ;;  %v5622_v25 = vrot.slane %v9536_v6, %v5621_v39 }
 0x2f0   : > { %v5501_v2 = vpop.permute.xlu1 %5500 }
 0x2f1   : > { %v5668_v3 = vrot.slane %v5501_v2, %v5565_v46 }
 0x2f2   : > { %v9551_v44 = vpop.permute.xlu0 %5479 }
 0x2f3   : > { %v5669_v36 = vsel %vm5567_vm4, %v5668_v3, %v5664_v11  ;;  %v5635_v3 = vsub.s32 %v5632_v22, %v9995_v50  ;;  %v5629_v53 = vrot.slane %v9551_v44, %v5628_v0 }
 0x2f4   : > { %v5674_v14 = vsel %vm5574_vm5, %v5673_v4, %v5669_v36 }
 0x2f6   : > { %v9518_v61 = vpop.permute.xlu1 %5509 }
 0x2f7   : > { %v5683_v34 = vrot.slane %v9518_v61, %v5586_v10  ;;  %v5483_v61 = vpop.permute.xlu0 %5482  ;;  %v2270_v10 = vld [vmem:[%s9492_s5] sm:$0x3] }
 0x2f8   : > { %v5636_v11 = vrot.slane %v5483_v61, %v5635_v3 }
 0x2fa   : > { %v5507_v5 = vpop.permute.xlu1 %5506 }
 0x2fb   : > { %v5678_v49 = vrot.slane %v5507_v5, %v5579_v12  ;;  %v5582_v5 = vsel %vm5581_vm6, %v5580_v16, %v5575_v57 }
 0x2fc   : > { %v5589_v37 = vsel %vm5588_vm7, %v5587_v35, %v5582_v5  ;;  %v5486_v12 = vpop.permute.xlu0 %5485 }
 0x2fd   : > { %v5679_v17 = vsel %vm5581_vm6, %v5678_v49, %v5674_v14  ;;  %v5596_v62 = vsel %vm5595_vm8, %v5594_v52, %v5589_v37  ;;  %v5643_v50 = vrot.slane %v5486_v12, %v5642_v9 }
 0x2fe   : > { %v5684_v42 = vsel %vm5588_vm7, %v5683_v34, %v5679_v17  ;;  %v5752_v17 = vstv %s5751_s7 }
 0x2ff   : > { %v9527_v27 = vpop.permute.xlu1 %5515 }
 0x300   : > { %v5693_v46 = vrot.slane %v9527_v27, %v5600_v26  ;;  %v5603_v27 = vsel %vm5602_vm9, %v5601_v43, %v5596_v62 }
 0x301   : > { %v5610_v31 = vsel %vm5609_vm10, %v5608_v15, %v5603_v27 }
 0x302   : > { %v5617_v49 = vsel %vm5616_vm11, %v5615_v23, %v5610_v31 }
 0x303   : > { %v5513_v45 = vpop.permute.xlu1 %5512  ;;  %v5624_v58 = vsel %vm5623_vm12, %v5622_v25, %v5617_v49 }
 0x304   : > { %v5688_v2 = vrot.slane %v5513_v45, %v5593_v7  ;;  %v5631_v4 = vsel %vm5630_vm13, %v5629_v53, %v5624_v58 }
 0x305   : > { %v5638_v16 = vsel %vm5637_vm14, %v5636_v11, %v5631_v4 }
 0x306   : > { %v5689_v33 = vsel %vm5595_vm8, %v5688_v2, %v5684_v42  ;;  %v5645_v18 = vsel %vm5644_vm15, %v5643_v50, %v5638_v16 }
 0x307   : > { %v9542_v28 = vpop.permute.xlu1 %5521  ;;  %v5694_v59 = vsel %vm5602_vm9, %v5693_v46, %v5689_v33 }
 0x308   : > { %v5703_v63 = vrot.slane %v9542_v28, %v5614_v1 }
 0x30b   : > { %v5519_v30 = vpop.permute.xlu1 %5518 }
 0x30c   : > { %v5698_v48 = vrot.slane %v5519_v30, %v5607_v60 }
 0x30e   : > { %v5699_v56 = vsel %vm5609_vm10, %v5698_v48, %v5694_v59 }
 0x30f   : > { %v5528_v55 = vpop.permute.xlu1 %5527  ;;  %v5704_v13 = vsel %vm5616_vm11, %v5703_v63, %v5699_v56 }
 0x310   : > { %v5713_v28 = vrot.slane %v5528_v55, %v5628_v0 }
 0x313   : > { %v5525_v45 = vpop.permute.xlu1 %5524 }
 0x314   : > { %v5708_v19 = vrot.slane %v5525_v45, %v5621_v39 }
 0x316   : > { %v5709_v40 = vsel %vm5623_vm12, %v5708_v19, %v5704_v13 }
 0x317   : > { %v5531_v38 = vpop.permute.xlu1 %5530  ;;  %v5714_v8 = vsel %vm5630_vm13, %v5713_v28, %v5709_v40 }
 0x318   : > { %v5718_v36 = vrot.slane %v5531_v38, %v5635_v3 }
 0x31a   : > { %v5719_v7 = vsel %vm5637_vm14, %v5718_v36, %v5714_v8 }
 0x31b   : > { %v5534_v6 = vpop.permute.xlu1 %5533 }
 0x31c   : > { %v5723_v32 = vrot.slane %v5534_v6, %v5642_v9 }
 0x31e   : > { %v5724_v44 = vsel %vm5644_vm15, %v5723_v32, %v5719_v7 }
 0x31f   : > { %v5725_v30 = vcombine.low %v5645_v18, %v5724_v44 }
 0x321   : > { %v5732_v21 = vrot.slane %v5725_v30, %v8248_v54 }
 0x323   : > { %v5739_v20 = vrot.slane %v5732_v21, %v8248_v54 }
 0x325   : > { %v5741_v14 = vadd.f32 %v5739_v20, %v2270_v10 }
 0x327   : > { %5746 = vst.msk [vmem:[%s9492_s5] sm:$0x3] %vm9488_vm0, %v5741_v14 }
 0x32e   : > { %v5750_v2 = vld [vmem:[%s9492_s5] sm:$0x3] }
 0x32f   : > { %v5753_v57 = vadd.f32 %v5752_v17, %v5750_v2 }
 0x331   : > { %7138 = vtanh.f32 %v5753_v57 }
 0x33b   : > { %v7139_v47 = vpop.eup %7138 }
 0x33c   : > { %v5756_v34 = vmul.f32 0.1, %v7139_v47 }
 0x33e   : > { %v5757_v5 = vadd.f32 1.0, %v5756_v34 }
 0x340   : > { %5758 = vst.msk [vmem:[%s9492_s5] sm:$0x3] %vm9488_vm0, %v5757_v5 }
 0x341   : > { %7181 = shalt.err (!%p7178_p2)
}
 0x342   : > { %s7182_s11 = scalar_lea.hbm %s9598_s29, 32  ;;  %s7186_s10 = scalar_lea.hbm %s9652_s3, 160 }
 0x343   : > { %p7183_p4 = scmp.ne.s32.totalorder %s9598_s29, %s7182_s11  ;;  %p7187_p3 = scmp.lt.u32.totalorder %s9598_s29, %s9652_s3 }
 0x344   : > { %p7188_p7 = scmp.lt.u32.totalorder %s7186_s10, %s7182_s11  ;;  %p7190_p8 = scmp.lt.u32.totalorder %s7182_s11, %s9598_s29 }
 0x345   : > { %p7184_p5 = pnand %p7183_p4, %p7329_p9 }
 0x346   : > { %p7189_p10 = por %p7188_p7, %p7187_p3 }
 0x347   : > { %p7185_p6 = pneg %p7184_p5 }
 0x348   : > { %p7191_p11 = por %p7190_p8, %p7189_p10 }
 0x34a   : > { %p7192_p0 = pnand %p7191_p11, %p7185_p6 }
 0x34c   : > { %7195 = shalt.err (!%p7192_p0)
}
 0x34d   : > { %7076 = dma.vmem_to_hbm [thread:$0]  (%p7329_p9), %s9600_s13, 32, %s9598_s29, %s5760_s30  }
 0x34e PF: > { %p7082_p12 = scmp.ge.s32.totalorder %s7250_s19, 2  ;;  %s5786_s22 = sand.u32 1, %s7230_s14  }
 0x34f   : > { %p9996_p13 = scmp.ne.s32.totalorder %s9738_s27, 0  ;;  %s5787_s5 = scalar_lea.sflag [#allocation5], %s5786_s22 }
 0x351   : > { %p7079_p1 = pnand %p7082_p12, %p9996_p13 }
 0x353   : > { %7225 = dma.done.wait (!%p7079_p1), %s5787_s5, 32  }
 0x354   : > { %7227 = vsyncadd (!%p7079_p1), %s5787_s5, 4294967264  ;;  %s20_s19 = sadd.s32 1, %s7250_s19   ;;  %s9997_s14 = smov %s7234_s15 }
 0x355   : > { %p17_p2 = scmp.ge.s32.totalorder %s20_s19, 7   ;;  %s9998_s15 = smov %s7238_s16 }
 0x356   : > { %s9999_s16 = smov %s7334_s26  ;;  %s10000_s17 = smov %s7246_s18 }
 0x357   : > { %s10001_s18 = smov %s10003_s21  ;;  %19 = sbr.rel (!%p17_p2) target bundleno = 8 (0x8), region = 88 }
 0x35e   :  { %5792 = vsyncpa [#allocation4], 1 }
 0x35f   :  { %5794 = vsyncpa [#allocation4 + $0x1], 1 }
 0x360   :  { %5795 = vsyncpa [#allocation5], 1 }
 0x361   :  { %5797 = vsyncpa [#allocation5 + $0x1], 1 }

</bundles_post_ra>
